<compile_context>
chip_gen: v5e
topology: v5e:2x2
jax: 0.10.0
libtpu: 0.0.40
codegen_flags: <defaults>
</compile_context>

<pallas_src>
import numpy as np

import jax
import jax.numpy as jnp
from jax.experimental import pallas as pl
from jax.experimental.pallas import tpu as pltpu

_EPS = 1e-5
_HOP = 8   # every intermediate row count is padded to 8 sublanes


# ------------------------------- fused kernel -------------------------------

def _resnet_fused_kernel(x_ref,
                         sel_stem_ref, g_stem_ref, b_stem_ref,
                         sel_pool_ref, colsel_pool_ref,
                         sel_l1_ref, g_l1c1_ref, b_l1c1_ref,
                         g_l1c2_ref, b_l1c2_ref,
                         sel_l2c1_ref, g_l2c1_ref, b_l2c1_ref, split_l2_ref,
                         sel_l2c2_ref, g_l2c2_ref, b_l2c2_ref,
                         gap_row_ref, gap_col_ref,
                         out_ref):
    """Whole ResNet forward for ONE image, entirely VMEM/vreg resident."""
    f32, bf16 = jnp.float32, jnp.bfloat16

    def conv_bn(x, sel_ref, g_ref, b_ref):
        # x   : [Hi_pad, Wi*Cin] activation (f32 or bf16)
        # sel : [kh*8, Hi_pad]   0/1 row gather (vertical taps, stride, H-pad)
        # g   : [kh, Wi*Cin, Wo*Cout] Toeplitz weights (BN scale, W-pad/stride)
        # b   : [1, Wo*Cout]     folded BN shift, tiled over Wo
        # returns [8, Wo*Cout] f32 (rows >= true Ho are don't-care padding)
        kh = g_ref.shape[0]
        hop = sel_ref.shape[0] // kh
        rows = jnp.dot(sel_ref[...], x.astype(f32), preferred_element_type=f32)
        acc = None
        for dy in range(kh):                       # static unroll, kh <= 7
            tap = rows[dy * hop:(dy + 1) * hop, :].astype(bf16)
            d = jnp.dot(tap, g_ref[dy], preferred_element_type=f32)
            acc = d if acc is None else acc + d
        return acc + b_ref[...]

    x0 = x_ref[0]                                              # [16, 48] bf16

    # Stem: 7x7/s2/p3 conv + BN + ReLU -> 8x8x16 carried as [8, 128].
    a = jnp.maximum(conv_bn(x0, sel_stem_ref, g_stem_ref, b_stem_ref), 0.0)

    # MaxPool 3x3/s2/p1 -> 4x4x16 as [8, 64] (rows >= 4 are zero padding).
    # Vertical taps via a row-gather matmul, horizontal taps via per-tap
    # column-gather matmuls; OOB taps contribute 0 (safe on post-ReLU data).
    rp = jnp.dot(sel_pool_ref[...], a, preferred_element_type=f32)  # [24, 128]
    hop = rp.shape[0] // 3
    tmp = jnp.maximum(jnp.maximum(rp[0:hop], rp[hop:2 * hop]), rp[2 * hop:])
    p = jnp.dot(tmp, colsel_pool_ref[0], preferred_element_type=f32)
    p = jnp.maximum(p, jnp.dot(tmp, colsel_pool_ref[1],
                               preferred_element_type=f32))
    p = jnp.maximum(p, jnp.dot(tmp, colsel_pool_ref[2],
                               preferred_element_type=f32))            # [8, 64]

    # Layer1 BasicBlock (16 -> 16, stride 1); residual add stays in f32.
    y = jnp.maximum(conv_bn(p, sel_l1_ref, g_l1c1_ref, b_l1c1_ref), 0.0)
    z = conv_bn(y, sel_l1_ref, g_l1c2_ref, b_l1c2_ref)
    x1 = jnp.maximum(z + p, 0.0)                                        # [8, 64]

    # Layer2 BasicBlock (16 -> 32, stride 2): the 1x1/s2 projection is fused as
    # channels 32:64 of each Wo block of conv1's output.  ReLU only applies to
    # the conv1 half -> in-kernel iota mask (no mask input, no extra DMA).
    fzd = conv_bn(x1, sel_l2c1_ref, g_l2c1_ref, b_l2c1_ref)            # [8, 128]
    lane = jax.lax.broadcasted_iota(jnp.int32, fzd.shape, 1)
    is_conv1 = jnp.bitwise_and(lane, 63) < 32
    fzd = jnp.where(is_conv1, jnp.maximum(fzd, 0.0), fzd)
    y1 = jnp.dot(fzd, split_l2_ref[0], preferred_element_type=f32)     # [8, 64]
    sc = jnp.dot(fzd, split_l2_ref[1], preferred_element_type=f32)     # [8, 64]
    z2 = conv_bn(y1, sel_l2c2_ref, g_l2c2_ref, b_l2c2_ref)
    x2 = jnp.maximum(z2 + sc, 0.0)                          # [8, 64] == 2x2x32

    # Global average pool (2x2 spatial -> 32 features).  gap_row also masks the
    # padded rows; gap_col sums the two column blocks.
    srow = jnp.dot(gap_row_ref[...], x2, preferred_element_type=f32)   # [1, 64]
    out_ref[0] = jnp.dot(srow, gap_col_ref[...], preferred_element_type=f32)


# -------------------------------- parameters --------------------------------

def init_params(key):
    """Kernel-ready params (Toeplitz weights, 0/1 gather matrices, folded BN)
    plus a plain-JAX reference param set for the same BN-folded network."""
    keys = iter(jax.random.split(key, 30))

    def conv_w(kh, kw, cin, cout):
        w = jax.random.normal(next(keys), (kh, kw, cin, cout), jnp.float32)
        return (np.asarray(w) * np.sqrt(2.0 / (kh * kw * cin))).astype(np.float32)

    def bn_fold(c):
        g = 1.0 + 0.1 * np.asarray(jax.random.normal(next(keys), (c,), jnp.float32))
        b = 0.1 * np.asarray(jax.random.normal(next(keys), (c,), jnp.float32))
        m = 0.1 * np.asarray(jax.random.normal(next(keys), (c,), jnp.float32))
        v = np.abs(1.0 + 0.1 * np.asarray(jax.random.normal(next(keys), (c,), jnp.float32)))
        scale = (g / np.sqrt(v + _EPS)).astype(np.float32)
        return scale, (b - m * scale).astype(np.float32)

    # static geometry (16x16 RGB input)
    H = W = 16
    CIN, C1, C2 = 3, 16, 32
    H1 = (H + 2 * 3 - 7) // 2 + 1          # 8  : stem output
    HP = (H1 + 2 * 1 - 3) // 2 + 1         # 4  : after maxpool
    H2 = (HP + 2 * 1 - 3) // 2 + 1         # 2  : layer2 output
    # The 1x1/s2/p0 projection must land on the same grid as the 3x3/s2/p1 conv
    # it is fused with (centre-tap embedding) -- reviewer-requested assert.
    assert (HP - 1) // 2 + 1 == H2

    def toeplitz(w, stride, pad, wi, wo):
        kh, kw, cin, cout = w.shape
        g = np.zeros((kh, wi * cin, wo * cout), np.float32)
        for dy in range(kh):
            for o in range(wo):
                for dx in range(kw):
                    col = o * stride - pad + dx
                    if 0 <= col < wi:
                        g[dy, col * cin:(col + 1) * cin,
                          o * cout:(o + 1) * cout] = w[dy, dx]
        return jnp.asarray(g, jnp.bfloat16)

    def row_select(kh, stride, pad, hi, ho, hi_cols):
        s = np.zeros((kh * _HOP, hi_cols), np.float32)
        for dy in range(kh):
            for yy in range(ho):
                r = yy * stride - pad + dy
                if 0 <= r < hi:
                    s[dy * _HOP + yy, r] = 1.0
        return jnp.asarray(s, jnp.float32)

    def tiled_bias(b, wo):
        return jnp.asarray(np.tile(b, wo)[None, :], jnp.float32)

    p, ref = {}, {}

    # stem: 7x7/s2/p3 conv + BN
    w = conv_w(7, 7, CIN, C1); s, b = bn_fold(C1); w = w * s
    p["sel_stem"] = row_select(7, 2, 3, H, H1, H)
    p["g_stem"] = toeplitz(w, 2, 3, W, H1)
    p["b_stem"] = tiled_bias(b, H1)
    ref["stem_w"], ref["stem_b"] = jnp.asarray(w, jnp.float32), jnp.asarray(b, jnp.float32)

    # maxpool 3x3/s2/p1: row gather + 3 per-tap column gathers
    p["sel_pool"] = row_select(3, 2, 1, H1, HP, H1)
    colsel = np.zeros((3, H1 * C1, HP * C1), np.float32)
    for d in range(3):
        for o in range(HP):
            win = 2 * o - 1 + d
            if 0 <= win < H1:
                colsel[d, win * C1:(win + 1) * C1, o * C1:(o + 1) * C1] = np.eye(C1)
    p["colsel_pool"] = jnp.asarray(colsel, jnp.float32)

    # layer1 BasicBlock (16 -> 16, stride 1)
    p["sel_l1"] = row_select(3, 1, 1, HP, HP, _HOP)
    w = conv_w(3, 3, C1, C1); s, b = bn_fold(C1); w = w * s
    p["g_l1c1"] = toeplitz(w, 1, 1, HP, HP); p["b_l1c1"] = tiled_bias(b, HP)
    ref["l1c1_w"], ref["l1c1_b"] = jnp.asarray(w, jnp.float32), jnp.asarray(b, jnp.float32)
    w = conv_w(3, 3, C1, C1); s, b = bn_fold(C1); w = w * s
    p["g_l1c2"] = toeplitz(w, 1, 1, HP, HP); p["b_l1c2"] = tiled_bias(b, HP)
    ref["l1c2_w"], ref["l1c2_b"] = jnp.asarray(w, jnp.float32), jnp.asarray(b, jnp.float32)

    # layer2 BasicBlock (16 -> 32, stride 2) with fused 1x1/s2 projection
    w = conv_w(3, 3, C1, C2); s, b = bn_fold(C2); wc1 = w * s; bc1 = b
    w = conv_w(1, 1, C1, C2); s, b = bn_fold(C2); wds = w * s; bds = b
    wf = np.zeros((3, 3, C1, 2 * C2), np.float32)
    wf[:, :, :, :C2] = wc1
    wf[1, 1, :, C2:] = wds[0, 0]          # projection = centre tap of the 3x3 grid
    p["sel_l2c1"] = row_select(3, 2, 1, HP, H2, _HOP)
    p["g_l2c1"] = toeplitz(wf, 2, 1, HP, H2)
    p["b_l2c1"] = tiled_bias(np.concatenate([bc1, bds]), H2)
    ref["l2c1_w"], ref["l2c1_b"] = jnp.asarray(wc1, jnp.float32), jnp.asarray(bc1, jnp.float32)
    ref["l2ds_w"], ref["l2ds_b"] = jnp.asarray(wds, jnp.float32), jnp.asarray(bds, jnp.float32)
    split = np.zeros((2, H2 * 2 * C2, H2 * C2), np.float32)
    for o in range(H2):
        split[0, o * 2 * C2:o * 2 * C2 + C2, o * C2:(o + 1) * C2] = np.eye(C2)
        split[1, o * 2 * C2 + C2:(o + 1) * 2 * C2, o * C2:(o + 1) * C2] = np.eye(C2)
    p["split_l2"] = jnp.asarray(split, jnp.float32)

    w = conv_w(3, 3, C2, C2); s, b = bn_fold(C2); w = w * s
    p["sel_l2c2"] = row_select(3, 1, 1, H2, H2, _HOP)
    p["g_l2c2"] = toeplitz(w, 1, 1, H2, H2); p["b_l2c2"] = tiled_bias(b, H2)
    ref["l2c2_w"], ref["l2c2_b"] = jnp.asarray(w, jnp.float32), jnp.asarray(b, jnp.float32)

    # global average pool: row mask (+ 1/(H2*W2)) and column-block sum
    gap_row = np.zeros((1, _HOP), np.float32)
    gap_row[0, :H2] = 1.0 / (H2 * H2)
    p["gap_row"] = jnp.asarray(gap_row, jnp.float32)
    gap_col = np.zeros((H2 * C2, C2), np.float32)
    for o in range(H2):
        gap_col[o * C2:(o + 1) * C2, :] = np.eye(C2)
    p["gap_col"] = jnp.asarray(gap_col, jnp.float32)

    return p, ref


# --------------------------------- forward ----------------------------------

_ORDER = ("sel_stem", "g_stem", "b_stem",
          "sel_pool", "colsel_pool",
          "sel_l1", "g_l1c1", "b_l1c1", "g_l1c2", "b_l1c2",
          "sel_l2c1", "g_l2c1", "b_l2c1", "split_l2",
          "sel_l2c2", "g_l2c2", "b_l2c2",
          "gap_row", "gap_col")


def resnet_forward(params, x_nchw):
    """Pooled backbone features (timm num_classes=0) via ONE fused Pallas call."""
    N, C, H, W = x_nchw.shape
    assert (C, H, W) == (3, 16, 16), "params were built for 3x16x16 inputs"
    # NCHW -> row-major flattened NHWC rows [N, H, W*C]: the ONLY activation
    # tensor that touches HBM (no im2col inflation).
    x = jnp.transpose(x_nchw, (0, 2, 3, 1)).reshape(N, H, W * C)
    x = x.astype(jnp.bfloat16)

    def full_spec(arr):
        nd = arr.ndim
        return pl.BlockSpec(arr.shape, lambda n, _nd=nd: (0,) * _nd)

    in_specs = [pl.BlockSpec((1, H, W * C), lambda n: (n, 0, 0))]
    in_specs += [full_spec(params[k]) for k in _ORDER]

    out = pl.pallas_call(
        _resnet_fused_kernel,
        out_shape=jax.ShapeDtypeStruct((N, 1, 32), jnp.float32),
        grid=(N,),
        in_specs=in_specs,
        out_specs=pl.BlockSpec((1, 1, 32), lambda n: (n, 0, 0)),
        compiler_params=pltpu.CompilerParams(
            dimension_semantics=("parallel",)),   # batch across TCs on v7x
    )(x, *[params[k] for k in _ORDER])
    return out.reshape(N, 32)


def _reference_forward(ref, x_nchw):
    """Plain-JAX (XLA) f32 reference of the same BN-folded network."""
    x = jnp.transpose(x_nchw, (0, 2, 3, 1)).astype(jnp.float32)

    def conv(v, w, b, stride, pad):
        y = jax.lax.conv_general_dilated(
            v, w, (stride, stride), [(pad, pad), (pad, pad)],
            dimension_numbers=("NHWC", "HWIO", "NHWC"))
        return y + b

    a = jax.nn.relu(conv(x, ref["stem_w"], ref["stem_b"], 2, 3))
    p = jax.lax.reduce_window(a, -jnp.inf, jax.lax.max, (1, 3, 3, 1),
                              (1, 2, 2, 1), [(0, 0), (1, 1), (1, 1), (0, 0)])
    y = jax.nn.relu(conv(p, ref["l1c1_w"], ref["l1c1_b"], 1, 1))
    x1 = jax.nn.relu(conv(y, ref["l1c2_w"], ref["l1c2_b"], 1, 1) + p)
    y1 = jax.nn.relu(conv(x1, ref["l2c1_w"], ref["l2c1_b"], 2, 1))
    sc = conv(x1, ref["l2ds_w"], ref["l2ds_b"], 2, 0)
    x2 = jax.nn.relu(conv(y1, ref["l2c2_w"], ref["l2c2_b"], 1, 1) + sc)
    return jnp.mean(x2, axis=(1, 2))


if __name__ == "__main__":
    key = jax.random.PRNGKey(0)
    k_param, k_x = jax.random.split(key)
    params, ref_params = init_params(k_param)

    # Small NCHW input (PyTorch convention): batch=2, RGB, 16x16.
    x = jax.random.normal(k_x, (2, 3, 16, 16), jnp.float32)

    fwd = jax.jit(resnet_forward)
    feats = jax.block_until_ready(fwd(params, x))          # [2, 32] features
    assert feats.shape == (2, 32) and feats.dtype == jnp.float32

    # Correctness vs. a plain-JAX f32 reference of the same BN-folded network
    # (kernel uses bf16 MXU operands with f32 accumulation -> loose tolerance).
    want = jax.block_until_ready(jax.jit(_reference_forward)(ref_params, x))
    np.testing.assert_allclose(np.asarray(feats), np.asarray(want),
                               rtol=0.1, atol=0.05)

    print("KERNEL_OK")
</pallas_src>

<mosaic_0001>
module attributes {stable_mosaic.version = 11 : i64} {
  func.func @_resnet_fused_kernel(%arg0: i32, %arg1: memref<1x16x48xbf16, #tpu.memory_space<vmem>>, %arg2: memref<56x16xf32, #tpu.memory_space<vmem>>, %arg3: memref<7x48x128xbf16, #tpu.memory_space<vmem>>, %arg4: memref<1x128xf32, #tpu.memory_space<vmem>>, %arg5: memref<24x8xf32, #tpu.memory_space<vmem>>, %arg6: memref<3x128x64xf32, #tpu.memory_space<vmem>>, %arg7: memref<24x8xf32, #tpu.memory_space<vmem>>, %arg8: memref<3x64x64xbf16, #tpu.memory_space<vmem>>, %arg9: memref<1x64xf32, #tpu.memory_space<vmem>>, %arg10: memref<3x64x64xbf16, #tpu.memory_space<vmem>>, %arg11: memref<1x64xf32, #tpu.memory_space<vmem>>, %arg12: memref<24x8xf32, #tpu.memory_space<vmem>>, %arg13: memref<3x64x128xbf16, #tpu.memory_space<vmem>>, %arg14: memref<1x128xf32, #tpu.memory_space<vmem>>, %arg15: memref<2x128x64xf32, #tpu.memory_space<vmem>>, %arg16: memref<24x8xf32, #tpu.memory_space<vmem>>, %arg17: memref<3x64x64xbf16, #tpu.memory_space<vmem>>, %arg18: memref<1x64xf32, #tpu.memory_space<vmem>>, %arg19: memref<1x8xf32, #tpu.memory_space<vmem>>, %arg20: memref<64x32xf32, #tpu.memory_space<vmem>>, %arg21: memref<1x1x32xf32, #tpu.memory_space<vmem>>) attributes {dimension_semantics = [#tpu.dimension_semantics<parallel>], iteration_bounds = array<i64: 2>, scalar_prefetch = 0 : i64, scratch_operands = 0 : i64, tpu.core_type = #tpu.core_type<tc>, window_params = [{transform_indices = @transform_0, window_bounds = array<i64: 1, 16, 48>}, {pipeline_mode = #tpu.pipeline_mode<synchronous>, transform_indices = @transform_1, window_bounds = array<i64: 56, 16>}, {pipeline_mode = #tpu.pipeline_mode<synchronous>, transform_indices = @transform_2, window_bounds = array<i64: 7, 48, 128>}, {pipeline_mode = #tpu.pipeline_mode<synchronous>, transform_indices = @transform_3, window_bounds = array<i64: 1, 128>}, {pipeline_mode = #tpu.pipeline_mode<synchronous>, transform_indices = @transform_4, window_bounds = array<i64: 24, 8>}, {pipeline_mode = #tpu.pipeline_mode<synchronous>, transform_indices = @transform_5, window_bounds = array<i64: 3, 128, 64>}, {pipeline_mode = #tpu.pipeline_mode<synchronous>, transform_indices = @transform_6, window_bounds = array<i64: 24, 8>}, {pipeline_mode = #tpu.pipeline_mode<synchronous>, transform_indices = @transform_7, window_bounds = array<i64: 3, 64, 64>}, {pipeline_mode = #tpu.pipeline_mode<synchronous>, transform_indices = @transform_8, window_bounds = array<i64: 1, 64>}, {pipeline_mode = #tpu.pipeline_mode<synchronous>, transform_indices = @transform_9, window_bounds = array<i64: 3, 64, 64>}, {pipeline_mode = #tpu.pipeline_mode<synchronous>, transform_indices = @transform_10, window_bounds = array<i64: 1, 64>}, {pipeline_mode = #tpu.pipeline_mode<synchronous>, transform_indices = @transform_11, window_bounds = array<i64: 24, 8>}, {pipeline_mode = #tpu.pipeline_mode<synchronous>, transform_indices = @transform_12, window_bounds = array<i64: 3, 64, 128>}, {pipeline_mode = #tpu.pipeline_mode<synchronous>, transform_indices = @transform_13, window_bounds = array<i64: 1, 128>}, {pipeline_mode = #tpu.pipeline_mode<synchronous>, transform_indices = @transform_14, window_bounds = array<i64: 2, 128, 64>}, {pipeline_mode = #tpu.pipeline_mode<synchronous>, transform_indices = @transform_15, window_bounds = array<i64: 24, 8>}, {pipeline_mode = #tpu.pipeline_mode<synchronous>, transform_indices = @transform_16, window_bounds = array<i64: 3, 64, 64>}, {pipeline_mode = #tpu.pipeline_mode<synchronous>, transform_indices = @transform_17, window_bounds = array<i64: 1, 64>}, {pipeline_mode = #tpu.pipeline_mode<synchronous>, transform_indices = @transform_18, window_bounds = array<i64: 1, 8>}, {pipeline_mode = #tpu.pipeline_mode<synchronous>, transform_indices = @transform_19, window_bounds = array<i64: 64, 32>}, {transform_indices = @transform_20, window_bounds = array<i64: 1, 1, 32>}]} {
    %c0 = arith.constant 0 : index
    %c0_0 = arith.constant 0 : index
    %c0_1 = arith.constant 0 : index
    %0 = vector.load %arg1[%c0, %c0_0, %c0_1] : memref<1x16x48xbf16, #tpu.memory_space<vmem>>, vector<1x16x48xbf16>
    %1 = vector.shape_cast %0 : vector<1x16x48xbf16> to vector<16x48xbf16>
    %c0_2 = arith.constant 0 : index
    %c0_3 = arith.constant 0 : index
    %2 = vector.load %arg2[%c0_2, %c0_3] : memref<56x16xf32, #tpu.memory_space<vmem>>, vector<56x16xf32>
    %3 = arith.extf %1 : vector<16x48xbf16> to vector<16x48xf32>
    %cst = arith.constant dense<0.000000e+00> : vector<56x48xf32>
    %4 = tpu.matmul %2, %3, %cst {dimension_numbers = #tpu.dot_dimension_numbers<[1], [0], [0], [1], [0, 0, 1, 1], [], []>} : vector<56x16xf32>, vector<16x48xf32>, vector<56x48xf32> -> vector<56x48xf32>
    %5 = vector.extract_strided_slice %4 {offsets = [0, 0], sizes = [8, 48], strides = [1, 1]} : vector<56x48xf32> to vector<8x48xf32>
    %6 = arith.truncf %5 : vector<8x48xf32> to vector<8x48xbf16>
    %c0_4 = arith.constant 0 : index
    %c0_5 = arith.constant 0 : index
    %c0_6 = arith.constant 0 : index
    %7 = vector.load %arg3[%c0_4, %c0_5, %c0_6] : memref<7x48x128xbf16, #tpu.memory_space<vmem>>, vector<1x48x128xbf16>
    %8 = vector.shape_cast %7 : vector<1x48x128xbf16> to vector<48x128xbf16>
    %cst_7 = arith.constant dense<0.000000e+00> : vector<8x128xf32>
    %9 = tpu.matmul %6, %8, %cst_7 {dimension_numbers = #tpu.dot_dimension_numbers<[1], [0], [0], [1], [0, 0, 1, 1], [], []>} : vector<8x48xbf16>, vector<48x128xbf16>, vector<8x128xf32> -> vector<8x128xf32>
    %10 = vector.extract_strided_slice %4 {offsets = [8, 0], sizes = [8, 48], strides = [1, 1]} : vector<56x48xf32> to vector<8x48xf32>
    %11 = arith.truncf %10 : vector<8x48xf32> to vector<8x48xbf16>
    %c1 = arith.constant 1 : index
    %c0_8 = arith.constant 0 : index
    %c0_9 = arith.constant 0 : index
    %12 = vector.load %arg3[%c1, %c0_8, %c0_9] : memref<7x48x128xbf16, #tpu.memory_space<vmem>>, vector<1x48x128xbf16>
    %13 = vector.shape_cast %12 : vector<1x48x128xbf16> to vector<48x128xbf16>
    %cst_10 = arith.constant dense<0.000000e+00> : vector<8x128xf32>
    %14 = tpu.matmul %11, %13, %cst_10 {dimension_numbers = #tpu.dot_dimension_numbers<[1], [0], [0], [1], [0, 0, 1, 1], [], []>} : vector<8x48xbf16>, vector<48x128xbf16>, vector<8x128xf32> -> vector<8x128xf32>
    %15 = arith.addf %9, %14 : vector<8x128xf32>
    %16 = vector.extract_strided_slice %4 {offsets = [16, 0], sizes = [8, 48], strides = [1, 1]} : vector<56x48xf32> to vector<8x48xf32>
    %17 = arith.truncf %16 : vector<8x48xf32> to vector<8x48xbf16>
    %c2 = arith.constant 2 : index
    %c0_11 = arith.constant 0 : index
    %c0_12 = arith.constant 0 : index
    %18 = vector.load %arg3[%c2, %c0_11, %c0_12] : memref<7x48x128xbf16, #tpu.memory_space<vmem>>, vector<1x48x128xbf16>
    %19 = vector.shape_cast %18 : vector<1x48x128xbf16> to vector<48x128xbf16>
    %cst_13 = arith.constant dense<0.000000e+00> : vector<8x128xf32>
    %20 = tpu.matmul %17, %19, %cst_13 {dimension_numbers = #tpu.dot_dimension_numbers<[1], [0], [0], [1], [0, 0, 1, 1], [], []>} : vector<8x48xbf16>, vector<48x128xbf16>, vector<8x128xf32> -> vector<8x128xf32>
    %21 = arith.addf %15, %20 : vector<8x128xf32>
    %22 = vector.extract_strided_slice %4 {offsets = [24, 0], sizes = [8, 48], strides = [1, 1]} : vector<56x48xf32> to vector<8x48xf32>
    %23 = arith.truncf %22 : vector<8x48xf32> to vector<8x48xbf16>
    %c3 = arith.constant 3 : index
    %c0_14 = arith.constant 0 : index
    %c0_15 = arith.constant 0 : index
    %24 = vector.load %arg3[%c3, %c0_14, %c0_15] : memref<7x48x128xbf16, #tpu.memory_space<vmem>>, vector<1x48x128xbf16>
    %25 = vector.shape_cast %24 : vector<1x48x128xbf16> to vector<48x128xbf16>
    %cst_16 = arith.constant dense<0.000000e+00> : vector<8x128xf32>
    %26 = tpu.matmul %23, %25, %cst_16 {dimension_numbers = #tpu.dot_dimension_numbers<[1], [0], [0], [1], [0, 0, 1, 1], [], []>} : vector<8x48xbf16>, vector<48x128xbf16>, vector<8x128xf32> -> vector<8x128xf32>
    %27 = arith.addf %21, %26 : vector<8x128xf32>
    %28 = vector.extract_strided_slice %4 {offsets = [32, 0], sizes = [8, 48], strides = [1, 1]} : vector<56x48xf32> to vector<8x48xf32>
    %29 = arith.truncf %28 : vector<8x48xf32> to vector<8x48xbf16>
    %c4 = arith.constant 4 : index
    %c0_17 = arith.constant 0 : index
    %c0_18 = arith.constant 0 : index
    %30 = vector.load %arg3[%c4, %c0_17, %c0_18] : memref<7x48x128xbf16, #tpu.memory_space<vmem>>, vector<1x48x128xbf16>
    %31 = vector.shape_cast %30 : vector<1x48x128xbf16> to vector<48x128xbf16>
    %cst_19 = arith.constant dense<0.000000e+00> : vector<8x128xf32>
    %32 = tpu.matmul %29, %31, %cst_19 {dimension_numbers = #tpu.dot_dimension_numbers<[1], [0], [0], [1], [0, 0, 1, 1], [], []>} : vector<8x48xbf16>, vector<48x128xbf16>, vector<8x128xf32> -> vector<8x128xf32>
    %33 = arith.addf %27, %32 : vector<8x128xf32>
    %34 = vector.extract_strided_slice %4 {offsets = [40, 0], sizes = [8, 48], strides = [1, 1]} : vector<56x48xf32> to vector<8x48xf32>
    %35 = arith.truncf %34 : vector<8x48xf32> to vector<8x48xbf16>
    %c5 = arith.constant 5 : index
    %c0_20 = arith.constant 0 : index
    %c0_21 = arith.constant 0 : index
    %36 = vector.load %arg3[%c5, %c0_20, %c0_21] : memref<7x48x128xbf16, #tpu.memory_space<vmem>>, vector<1x48x128xbf16>
    %37 = vector.shape_cast %36 : vector<1x48x128xbf16> to vector<48x128xbf16>
    %cst_22 = arith.constant dense<0.000000e+00> : vector<8x128xf32>
    %38 = tpu.matmul %35, %37, %cst_22 {dimension_numbers = #tpu.dot_dimension_numbers<[1], [0], [0], [1], [0, 0, 1, 1], [], []>} : vector<8x48xbf16>, vector<48x128xbf16>, vector<8x128xf32> -> vector<8x128xf32>
    %39 = arith.addf %33, %38 : vector<8x128xf32>
    %40 = vector.extract_strided_slice %4 {offsets = [48, 0], sizes = [8, 48], strides = [1, 1]} : vector<56x48xf32> to vector<8x48xf32>
    %41 = arith.truncf %40 : vector<8x48xf32> to vector<8x48xbf16>
    %c6 = arith.constant 6 : index
    %c0_23 = arith.constant 0 : index
    %c0_24 = arith.constant 0 : index
    %42 = vector.load %arg3[%c6, %c0_23, %c0_24] : memref<7x48x128xbf16, #tpu.memory_space<vmem>>, vector<1x48x128xbf16>
    %43 = vector.shape_cast %42 : vector<1x48x128xbf16> to vector<48x128xbf16>
    %cst_25 = arith.constant dense<0.000000e+00> : vector<8x128xf32>
    %44 = tpu.matmul %41, %43, %cst_25 {dimension_numbers = #tpu.dot_dimension_numbers<[1], [0], [0], [1], [0, 0, 1, 1], [], []>} : vector<8x48xbf16>, vector<48x128xbf16>, vector<8x128xf32> -> vector<8x128xf32>
    %45 = arith.addf %39, %44 : vector<8x128xf32>
    %c0_26 = arith.constant 0 : index
    %c0_27 = arith.constant 0 : index
    %46 = vector.load %arg4[%c0_26, %c0_27] : memref<1x128xf32, #tpu.memory_space<vmem>>, vector<1x128xf32>
    %47 = vector.broadcast %46 : vector<1x128xf32> to vector<8x128xf32>
    %48 = arith.addf %45, %47 : vector<8x128xf32>
    %cst_28 = arith.constant 0.000000e+00 : f32
    %49 = vector.broadcast %cst_28 : f32 to vector<8x128xf32>
    %50 = arith.maximumf %48, %49 : vector<8x128xf32>
    %c0_29 = arith.constant 0 : index
    %c0_30 = arith.constant 0 : index
    %51 = vector.load %arg5[%c0_29, %c0_30] : memref<24x8xf32, #tpu.memory_space<vmem>>, vector<24x8xf32>
    %cst_31 = arith.constant dense<0.000000e+00> : vector<24x128xf32>
    %52 = tpu.matmul %51, %50, %cst_31 {dimension_numbers = #tpu.dot_dimension_numbers<[1], [0], [0], [1], [0, 0, 1, 1], [], []>} : vector<24x8xf32>, vector<8x128xf32>, vector<24x128xf32> -> vector<24x128xf32>
    %53 = vector.extract_strided_slice %52 {offsets = [0, 0], sizes = [8, 128], strides = [1, 1]} : vector<24x128xf32> to vector<8x128xf32>
    %54 = vector.extract_strided_slice %52 {offsets = [8, 0], sizes = [8, 128], strides = [1, 1]} : vector<24x128xf32> to vector<8x128xf32>
    %55 = arith.maximumf %53, %54 : vector<8x128xf32>
    %56 = vector.extract_strided_slice %52 {offsets = [16, 0], sizes = [8, 128], strides = [1, 1]} : vector<24x128xf32> to vector<8x128xf32>
    %57 = arith.maximumf %55, %56 : vector<8x128xf32>
    %c0_32 = arith.constant 0 : index
    %c0_33 = arith.constant 0 : index
    %c0_34 = arith.constant 0 : index
    %58 = vector.load %arg6[%c0_32, %c0_33, %c0_34] : memref<3x128x64xf32, #tpu.memory_space<vmem>>, vector<1x128x64xf32>
    %59 = vector.shape_cast %58 : vector<1x128x64xf32> to vector<128x64xf32>
    %cst_35 = arith.constant dense<0.000000e+00> : vector<8x64xf32>
    %60 = tpu.matmul %57, %59, %cst_35 {dimension_numbers = #tpu.dot_dimension_numbers<[1], [0], [0], [1], [0, 0, 1, 1], [], []>} : vector<8x128xf32>, vector<128x64xf32>, vector<8x64xf32> -> vector<8x64xf32>
    %c1_36 = arith.constant 1 : index
    %c0_37 = arith.constant 0 : index
    %c0_38 = arith.constant 0 : index
    %61 = vector.load %arg6[%c1_36, %c0_37, %c0_38] : memref<3x128x64xf32, #tpu.memory_space<vmem>>, vector<1x128x64xf32>
    %62 = vector.shape_cast %61 : vector<1x128x64xf32> to vector<128x64xf32>
    %cst_39 = arith.constant dense<0.000000e+00> : vector<8x64xf32>
    %63 = tpu.matmul %57, %62, %cst_39 {dimension_numbers = #tpu.dot_dimension_numbers<[1], [0], [0], [1], [0, 0, 1, 1], [], []>} : vector<8x128xf32>, vector<128x64xf32>, vector<8x64xf32> -> vector<8x64xf32>
    %64 = arith.maximumf %60, %63 : vector<8x64xf32>
    %c2_40 = arith.constant 2 : index
    %c0_41 = arith.constant 0 : index
    %c0_42 = arith.constant 0 : index
    %65 = vector.load %arg6[%c2_40, %c0_41, %c0_42] : memref<3x128x64xf32, #tpu.memory_space<vmem>>, vector<1x128x64xf32>
    %66 = vector.shape_cast %65 : vector<1x128x64xf32> to vector<128x64xf32>
    %cst_43 = arith.constant dense<0.000000e+00> : vector<8x64xf32>
    %67 = tpu.matmul %57, %66, %cst_43 {dimension_numbers = #tpu.dot_dimension_numbers<[1], [0], [0], [1], [0, 0, 1, 1], [], []>} : vector<8x128xf32>, vector<128x64xf32>, vector<8x64xf32> -> vector<8x64xf32>
    %68 = arith.maximumf %64, %67 : vector<8x64xf32>
    %c0_44 = arith.constant 0 : index
    %c0_45 = arith.constant 0 : index
    %69 = vector.load %arg7[%c0_44, %c0_45] : memref<24x8xf32, #tpu.memory_space<vmem>>, vector<24x8xf32>
    %cst_46 = arith.constant dense<0.000000e+00> : vector<24x64xf32>
    %70 = tpu.matmul %69, %68, %cst_46 {dimension_numbers = #tpu.dot_dimension_numbers<[1], [0], [0], [1], [0, 0, 1, 1], [], []>} : vector<24x8xf32>, vector<8x64xf32>, vector<24x64xf32> -> vector<24x64xf32>
    %71 = vector.extract_strided_slice %70 {offsets = [0, 0], sizes = [8, 64], strides = [1, 1]} : vector<24x64xf32> to vector<8x64xf32>
    %72 = arith.truncf %71 : vector<8x64xf32> to vector<8x64xbf16>
    %c0_47 = arith.constant 0 : index
    %c0_48 = arith.constant 0 : index
    %c0_49 = arith.constant 0 : index
    %73 = vector.load %arg8[%c0_47, %c0_48, %c0_49] : memref<3x64x64xbf16, #tpu.memory_space<vmem>>, vector<1x64x64xbf16>
    %74 = vector.shape_cast %73 : vector<1x64x64xbf16> to vector<64x64xbf16>
    %cst_50 = arith.constant dense<0.000000e+00> : vector<8x64xf32>
    %75 = tpu.matmul %72, %74, %cst_50 {dimension_numbers = #tpu.dot_dimension_numbers<[1], [0], [0], [1], [0, 0, 1, 1], [], []>} : vector<8x64xbf16>, vector<64x64xbf16>, vector<8x64xf32> -> vector<8x64xf32>
    %76 = vector.extract_strided_slice %70 {offsets = [8, 0], sizes = [8, 64], strides = [1, 1]} : vector<24x64xf32> to vector<8x64xf32>
    %77 = arith.truncf %76 : vector<8x64xf32> to vector<8x64xbf16>
    %c1_51 = arith.constant 1 : index
    %c0_52 = arith.constant 0 : index
    %c0_53 = arith.constant 0 : index
    %78 = vector.load %arg8[%c1_51, %c0_52, %c0_53] : memref<3x64x64xbf16, #tpu.memory_space<vmem>>, vector<1x64x64xbf16>
    %79 = vector.shape_cast %78 : vector<1x64x64xbf16> to vector<64x64xbf16>
    %cst_54 = arith.constant dense<0.000000e+00> : vector<8x64xf32>
    %80 = tpu.matmul %77, %79, %cst_54 {dimension_numbers = #tpu.dot_dimension_numbers<[1], [0], [0], [1], [0, 0, 1, 1], [], []>} : vector<8x64xbf16>, vector<64x64xbf16>, vector<8x64xf32> -> vector<8x64xf32>
    %81 = arith.addf %75, %80 : vector<8x64xf32>
    %82 = vector.extract_strided_slice %70 {offsets = [16, 0], sizes = [8, 64], strides = [1, 1]} : vector<24x64xf32> to vector<8x64xf32>
    %83 = arith.truncf %82 : vector<8x64xf32> to vector<8x64xbf16>
    %c2_55 = arith.constant 2 : index
    %c0_56 = arith.constant 0 : index
    %c0_57 = arith.constant 0 : index
    %84 = vector.load %arg8[%c2_55, %c0_56, %c0_57] : memref<3x64x64xbf16, #tpu.memory_space<vmem>>, vector<1x64x64xbf16>
    %85 = vector.shape_cast %84 : vector<1x64x64xbf16> to vector<64x64xbf16>
    %cst_58 = arith.constant dense<0.000000e+00> : vector<8x64xf32>
    %86 = tpu.matmul %83, %85, %cst_58 {dimension_numbers = #tpu.dot_dimension_numbers<[1], [0], [0], [1], [0, 0, 1, 1], [], []>} : vector<8x64xbf16>, vector<64x64xbf16>, vector<8x64xf32> -> vector<8x64xf32>
    %87 = arith.addf %81, %86 : vector<8x64xf32>
    %c0_59 = arith.constant 0 : index
    %c0_60 = arith.constant 0 : index
    %88 = vector.load %arg9[%c0_59, %c0_60] : memref<1x64xf32, #tpu.memory_space<vmem>>, vector<1x64xf32>
    %89 = vector.broadcast %88 : vector<1x64xf32> to vector<8x64xf32>
    %90 = arith.addf %87, %89 : vector<8x64xf32>
    %cst_61 = arith.constant 0.000000e+00 : f32
    %91 = vector.broadcast %cst_61 : f32 to vector<8x64xf32>
    %92 = arith.maximumf %90, %91 : vector<8x64xf32>
    %c0_62 = arith.constant 0 : index
    %c0_63 = arith.constant 0 : index
    %93 = vector.load %arg7[%c0_62, %c0_63] : memref<24x8xf32, #tpu.memory_space<vmem>>, vector<24x8xf32>
    %cst_64 = arith.constant dense<0.000000e+00> : vector<24x64xf32>
    %94 = tpu.matmul %93, %92, %cst_64 {dimension_numbers = #tpu.dot_dimension_numbers<[1], [0], [0], [1], [0, 0, 1, 1], [], []>} : vector<24x8xf32>, vector<8x64xf32>, vector<24x64xf32> -> vector<24x64xf32>
    %95 = vector.extract_strided_slice %94 {offsets = [0, 0], sizes = [8, 64], strides = [1, 1]} : vector<24x64xf32> to vector<8x64xf32>
    %96 = arith.truncf %95 : vector<8x64xf32> to vector<8x64xbf16>
    %c0_65 = arith.constant 0 : index
    %c0_66 = arith.constant 0 : index
    %c0_67 = arith.constant 0 : index
    %97 = vector.load %arg10[%c0_65, %c0_66, %c0_67] : memref<3x64x64xbf16, #tpu.memory_space<vmem>>, vector<1x64x64xbf16>
    %98 = vector.shape_cast %97 : vector<1x64x64xbf16> to vector<64x64xbf16>
    %cst_68 = arith.constant dense<0.000000e+00> : vector<8x64xf32>
    %99 = tpu.matmul %96, %98, %cst_68 {dimension_numbers = #tpu.dot_dimension_numbers<[1], [0], [0], [1], [0, 0, 1, 1], [], []>} : vector<8x64xbf16>, vector<64x64xbf16>, vector<8x64xf32> -> vector<8x64xf32>
    %100 = vector.extract_strided_slice %94 {offsets = [8, 0], sizes = [8, 64], strides = [1, 1]} : vector<24x64xf32> to vector<8x64xf32>
    %101 = arith.truncf %100 : vector<8x64xf32> to vector<8x64xbf16>
    %c1_69 = arith.constant 1 : index
    %c0_70 = arith.constant 0 : index
    %c0_71 = arith.constant 0 : index
    %102 = vector.load %arg10[%c1_69, %c0_70, %c0_71] : memref<3x64x64xbf16, #tpu.memory_space<vmem>>, vector<1x64x64xbf16>
    %103 = vector.shape_cast %102 : vector<1x64x64xbf16> to vector<64x64xbf16>
    %cst_72 = arith.constant dense<0.000000e+00> : vector<8x64xf32>
    %104 = tpu.matmul %101, %103, %cst_72 {dimension_numbers = #tpu.dot_dimension_numbers<[1], [0], [0], [1], [0, 0, 1, 1], [], []>} : vector<8x64xbf16>, vector<64x64xbf16>, vector<8x64xf32> -> vector<8x64xf32>
    %105 = arith.addf %99, %104 : vector<8x64xf32>
    %106 = vector.extract_strided_slice %94 {offsets = [16, 0], sizes = [8, 64], strides = [1, 1]} : vector<24x64xf32> to vector<8x64xf32>
    %107 = arith.truncf %106 : vector<8x64xf32> to vector<8x64xbf16>
    %c2_73 = arith.constant 2 : index
    %c0_74 = arith.constant 0 : index
    %c0_75 = arith.constant 0 : index
    %108 = vector.load %arg10[%c2_73, %c0_74, %c0_75] : memref<3x64x64xbf16, #tpu.memory_space<vmem>>, vector<1x64x64xbf16>
    %109 = vector.shape_cast %108 : vector<1x64x64xbf16> to vector<64x64xbf16>
    %cst_76 = arith.constant dense<0.000000e+00> : vector<8x64xf32>
    %110 = tpu.matmul %107, %109, %cst_76 {dimension_numbers = #tpu.dot_dimension_numbers<[1], [0], [0], [1], [0, 0, 1, 1], [], []>} : vector<8x64xbf16>, vector<64x64xbf16>, vector<8x64xf32> -> vector<8x64xf32>
    %111 = arith.addf %105, %110 : vector<8x64xf32>
    %c0_77 = arith.constant 0 : index
    %c0_78 = arith.constant 0 : index
    %112 = vector.load %arg11[%c0_77, %c0_78] : memref<1x64xf32, #tpu.memory_space<vmem>>, vector<1x64xf32>
    %113 = vector.broadcast %112 : vector<1x64xf32> to vector<8x64xf32>
    %114 = arith.addf %111, %113 : vector<8x64xf32>
    %115 = arith.addf %114, %68 : vector<8x64xf32>
    %cst_79 = arith.constant 0.000000e+00 : f32
    %116 = vector.broadcast %cst_79 : f32 to vector<8x64xf32>
    %117 = arith.maximumf %115, %116 : vector<8x64xf32>
    %c0_80 = arith.constant 0 : index
    %c0_81 = arith.constant 0 : index
    %118 = vector.load %arg12[%c0_80, %c0_81] : memref<24x8xf32, #tpu.memory_space<vmem>>, vector<24x8xf32>
    %cst_82 = arith.constant dense<0.000000e+00> : vector<24x64xf32>
    %119 = tpu.matmul %118, %117, %cst_82 {dimension_numbers = #tpu.dot_dimension_numbers<[1], [0], [0], [1], [0, 0, 1, 1], [], []>} : vector<24x8xf32>, vector<8x64xf32>, vector<24x64xf32> -> vector<24x64xf32>
    %120 = vector.extract_strided_slice %119 {offsets = [0, 0], sizes = [8, 64], strides = [1, 1]} : vector<24x64xf32> to vector<8x64xf32>
    %121 = arith.truncf %120 : vector<8x64xf32> to vector<8x64xbf16>
    %c0_83 = arith.constant 0 : index
    %c0_84 = arith.constant 0 : index
    %c0_85 = arith.constant 0 : index
    %122 = vector.load %arg13[%c0_83, %c0_84, %c0_85] : memref<3x64x128xbf16, #tpu.memory_space<vmem>>, vector<1x64x128xbf16>
    %123 = vector.shape_cast %122 : vector<1x64x128xbf16> to vector<64x128xbf16>
    %cst_86 = arith.constant dense<0.000000e+00> : vector<8x128xf32>
    %124 = tpu.matmul %121, %123, %cst_86 {dimension_numbers = #tpu.dot_dimension_numbers<[1], [0], [0], [1], [0, 0, 1, 1], [], []>} : vector<8x64xbf16>, vector<64x128xbf16>, vector<8x128xf32> -> vector<8x128xf32>
    %125 = vector.extract_strided_slice %119 {offsets = [8, 0], sizes = [8, 64], strides = [1, 1]} : vector<24x64xf32> to vector<8x64xf32>
    %126 = arith.truncf %125 : vector<8x64xf32> to vector<8x64xbf16>
    %c1_87 = arith.constant 1 : index
    %c0_88 = arith.constant 0 : index
    %c0_89 = arith.constant 0 : index
    %127 = vector.load %arg13[%c1_87, %c0_88, %c0_89] : memref<3x64x128xbf16, #tpu.memory_space<vmem>>, vector<1x64x128xbf16>
    %128 = vector.shape_cast %127 : vector<1x64x128xbf16> to vector<64x128xbf16>
    %cst_90 = arith.constant dense<0.000000e+00> : vector<8x128xf32>
    %129 = tpu.matmul %126, %128, %cst_90 {dimension_numbers = #tpu.dot_dimension_numbers<[1], [0], [0], [1], [0, 0, 1, 1], [], []>} : vector<8x64xbf16>, vector<64x128xbf16>, vector<8x128xf32> -> vector<8x128xf32>
    %130 = arith.addf %124, %129 : vector<8x128xf32>
    %131 = vector.extract_strided_slice %119 {offsets = [16, 0], sizes = [8, 64], strides = [1, 1]} : vector<24x64xf32> to vector<8x64xf32>
    %132 = arith.truncf %131 : vector<8x64xf32> to vector<8x64xbf16>
    %c2_91 = arith.constant 2 : index
    %c0_92 = arith.constant 0 : index
    %c0_93 = arith.constant 0 : index
    %133 = vector.load %arg13[%c2_91, %c0_92, %c0_93] : memref<3x64x128xbf16, #tpu.memory_space<vmem>>, vector<1x64x128xbf16>
    %134 = vector.shape_cast %133 : vector<1x64x128xbf16> to vector<64x128xbf16>
    %cst_94 = arith.constant dense<0.000000e+00> : vector<8x128xf32>
    %135 = tpu.matmul %132, %134, %cst_94 {dimension_numbers = #tpu.dot_dimension_numbers<[1], [0], [0], [1], [0, 0, 1, 1], [], []>} : vector<8x64xbf16>, vector<64x128xbf16>, vector<8x128xf32> -> vector<8x128xf32>
    %136 = arith.addf %130, %135 : vector<8x128xf32>
    %c0_95 = arith.constant 0 : index
    %c0_96 = arith.constant 0 : index
    %137 = vector.load %arg14[%c0_95, %c0_96] : memref<1x128xf32, #tpu.memory_space<vmem>>, vector<1x128xf32>
    %138 = vector.broadcast %137 : vector<1x128xf32> to vector<8x128xf32>
    %139 = arith.addf %136, %138 : vector<8x128xf32>
    %140 = tpu.iota {dimensions = array<i32: 1>} : vector<8x128xi32>
    %c63_i32 = arith.constant 63 : i32
    %141 = vector.broadcast %c63_i32 : i32 to vector<8x128xi32>
    %142 = arith.andi %140, %141 : vector<8x128xi32>
    %c32_i32 = arith.constant 32 : i32
    %143 = vector.broadcast %c32_i32 : i32 to vector<8x128xi32>
    %144 = arith.cmpi slt, %142, %143 : vector<8x128xi32>
    %cst_97 = arith.constant 0.000000e+00 : f32
    %145 = vector.broadcast %cst_97 : f32 to vector<8x128xf32>
    %146 = arith.maximumf %139, %145 : vector<8x128xf32>
    %147 = arith.select %144, %146, %139 : vector<8x128xi1>, vector<8x128xf32>
    %c0_98 = arith.constant 0 : index
    %c0_99 = arith.constant 0 : index
    %c0_100 = arith.constant 0 : index
    %148 = vector.load %arg15[%c0_98, %c0_99, %c0_100] : memref<2x128x64xf32, #tpu.memory_space<vmem>>, vector<1x128x64xf32>
    %149 = vector.shape_cast %148 : vector<1x128x64xf32> to vector<128x64xf32>
    %cst_101 = arith.constant dense<0.000000e+00> : vector<8x64xf32>
    %150 = tpu.matmul %147, %149, %cst_101 {dimension_numbers = #tpu.dot_dimension_numbers<[1], [0], [0], [1], [0, 0, 1, 1], [], []>} : vector<8x128xf32>, vector<128x64xf32>, vector<8x64xf32> -> vector<8x64xf32>
    %c1_102 = arith.constant 1 : index
    %c0_103 = arith.constant 0 : index
    %c0_104 = arith.constant 0 : index
    %151 = vector.load %arg15[%c1_102, %c0_103, %c0_104] : memref<2x128x64xf32, #tpu.memory_space<vmem>>, vector<1x128x64xf32>
    %152 = vector.shape_cast %151 : vector<1x128x64xf32> to vector<128x64xf32>
    %cst_105 = arith.constant dense<0.000000e+00> : vector<8x64xf32>
    %153 = tpu.matmul %147, %152, %cst_105 {dimension_numbers = #tpu.dot_dimension_numbers<[1], [0], [0], [1], [0, 0, 1, 1], [], []>} : vector<8x128xf32>, vector<128x64xf32>, vector<8x64xf32> -> vector<8x64xf32>
    %c0_106 = arith.constant 0 : index
    %c0_107 = arith.constant 0 : index
    %154 = vector.load %arg16[%c0_106, %c0_107] : memref<24x8xf32, #tpu.memory_space<vmem>>, vector<24x8xf32>
    %cst_108 = arith.constant dense<0.000000e+00> : vector<24x64xf32>
    %155 = tpu.matmul %154, %150, %cst_108 {dimension_numbers = #tpu.dot_dimension_numbers<[1], [0], [0], [1], [0, 0, 1, 1], [], []>} : vector<24x8xf32>, vector<8x64xf32>, vector<24x64xf32> -> vector<24x64xf32>
    %156 = vector.extract_strided_slice %155 {offsets = [0, 0], sizes = [8, 64], strides = [1, 1]} : vector<24x64xf32> to vector<8x64xf32>
    %157 = arith.truncf %156 : vector<8x64xf32> to vector<8x64xbf16>
    %c0_109 = arith.constant 0 : index
    %c0_110 = arith.constant 0 : index
    %c0_111 = arith.constant 0 : index
    %158 = vector.load %arg17[%c0_109, %c0_110, %c0_111] : memref<3x64x64xbf16, #tpu.memory_space<vmem>>, vector<1x64x64xbf16>
    %159 = vector.shape_cast %158 : vector<1x64x64xbf16> to vector<64x64xbf16>
    %cst_112 = arith.constant dense<0.000000e+00> : vector<8x64xf32>
    %160 = tpu.matmul %157, %159, %cst_112 {dimension_numbers = #tpu.dot_dimension_numbers<[1], [0], [0], [1], [0, 0, 1, 1], [], []>} : vector<8x64xbf16>, vector<64x64xbf16>, vector<8x64xf32> -> vector<8x64xf32>
    %161 = vector.extract_strided_slice %155 {offsets = [8, 0], sizes = [8, 64], strides = [1, 1]} : vector<24x64xf32> to vector<8x64xf32>
    %162 = arith.truncf %161 : vector<8x64xf32> to vector<8x64xbf16>
    %c1_113 = arith.constant 1 : index
    %c0_114 = arith.constant 0 : index
    %c0_115 = arith.constant 0 : index
    %163 = vector.load %arg17[%c1_113, %c0_114, %c0_115] : memref<3x64x64xbf16, #tpu.memory_space<vmem>>, vector<1x64x64xbf16>
    %164 = vector.shape_cast %163 : vector<1x64x64xbf16> to vector<64x64xbf16>
    %cst_116 = arith.constant dense<0.000000e+00> : vector<8x64xf32>
    %165 = tpu.matmul %162, %164, %cst_116 {dimension_numbers = #tpu.dot_dimension_numbers<[1], [0], [0], [1], [0, 0, 1, 1], [], []>} : vector<8x64xbf16>, vector<64x64xbf16>, vector<8x64xf32> -> vector<8x64xf32>
    %166 = arith.addf %160, %165 : vector<8x64xf32>
    %167 = vector.extract_strided_slice %155 {offsets = [16, 0], sizes = [8, 64], strides = [1, 1]} : vector<24x64xf32> to vector<8x64xf32>
    %168 = arith.truncf %167 : vector<8x64xf32> to vector<8x64xbf16>
    %c2_117 = arith.constant 2 : index
    %c0_118 = arith.constant 0 : index
    %c0_119 = arith.constant 0 : index
    %169 = vector.load %arg17[%c2_117, %c0_118, %c0_119] : memref<3x64x64xbf16, #tpu.memory_space<vmem>>, vector<1x64x64xbf16>
    %170 = vector.shape_cast %169 : vector<1x64x64xbf16> to vector<64x64xbf16>
    %cst_120 = arith.constant dense<0.000000e+00> : vector<8x64xf32>
    %171 = tpu.matmul %168, %170, %cst_120 {dimension_numbers = #tpu.dot_dimension_numbers<[1], [0], [0], [1], [0, 0, 1, 1], [], []>} : vector<8x64xbf16>, vector<64x64xbf16>, vector<8x64xf32> -> vector<8x64xf32>
    %172 = arith.addf %166, %171 : vector<8x64xf32>
    %c0_121 = arith.constant 0 : index
    %c0_122 = arith.constant 0 : index
    %173 = vector.load %arg18[%c0_121, %c0_122] : memref<1x64xf32, #tpu.memory_space<vmem>>, vector<1x64xf32>
    %174 = vector.broadcast %173 : vector<1x64xf32> to vector<8x64xf32>
    %175 = arith.addf %172, %174 : vector<8x64xf32>
    %176 = arith.addf %175, %153 : vector<8x64xf32>
    %cst_123 = arith.constant 0.000000e+00 : f32
    %177 = vector.broadcast %cst_123 : f32 to vector<8x64xf32>
    %178 = arith.maximumf %176, %177 : vector<8x64xf32>
    %c0_124 = arith.constant 0 : index
    %c0_125 = arith.constant 0 : index
    %179 = vector.load %arg19[%c0_124, %c0_125] : memref<1x8xf32, #tpu.memory_space<vmem>>, vector<1x8xf32>
    %cst_126 = arith.constant dense<0.000000e+00> : vector<1x64xf32>
    %180 = tpu.matmul %179, %178, %cst_126 {dimension_numbers = #tpu.dot_dimension_numbers<[1], [0], [0], [1], [0, 0, 1, 1], [], []>} : vector<1x8xf32>, vector<8x64xf32>, vector<1x64xf32> -> vector<1x64xf32>
    %c0_127 = arith.constant 0 : index
    %c0_128 = arith.constant 0 : index
    %181 = vector.load %arg20[%c0_127, %c0_128] : memref<64x32xf32, #tpu.memory_space<vmem>>, vector<64x32xf32>
    %cst_129 = arith.constant dense<0.000000e+00> : vector<1x32xf32>
    %182 = tpu.matmul %180, %181, %cst_129 {dimension_numbers = #tpu.dot_dimension_numbers<[1], [0], [0], [1], [0, 0, 1, 1], [], []>} : vector<1x64xf32>, vector<64x32xf32>, vector<1x32xf32> -> vector<1x32xf32>
    %c0_130 = arith.constant 0 : index
    %c0_131 = arith.constant 0 : index
    %c0_132 = arith.constant 0 : index
    %183 = vector.load %arg21[%c0_130, %c0_131, %c0_132] : memref<1x1x32xf32, #tpu.memory_space<vmem>>, vector<1x1x32xf32>
    %184 = vector.shape_cast %183 : vector<1x1x32xf32> to vector<1x32xf32>
    %185 = vector.shape_cast %182 : vector<1x32xf32> to vector<1x1x32xf32>
    tpu.vector_store %arg21[%c0_130, %c0_131, %c0_132], %185 {strides = array<i32>} : memref<1x1x32xf32, #tpu.memory_space<vmem>>, vector<1x1x32xf32>,
    return
  }
  func.func @transform_0(%arg0: i32) -> (i32, i32, i32) {
    %c0_i32 = arith.constant 0 : i32
    %c0_i32_0 = arith.constant 0 : i32
    %c0_i32_1 = arith.constant 0 : i32
    return %arg0, %c0_i32, %c0_i32_0 : i32, i32, i32
  }
  func.func @transform_1(%arg0: i32) -> (i32, i32) {
    %c0_i32 = arith.constant 0 : i32
    %c0_i32_0 = arith.constant 0 : i32
    %c0_i32_1 = arith.constant 0 : i32
    return %c0_i32, %c0_i32_0 : i32, i32
  }
  func.func @transform_2(%arg0: i32) -> (i32, i32, i32) {
    %c0_i32 = arith.constant 0 : i32
    %c0_i32_0 = arith.constant 0 : i32
    %c0_i32_1 = arith.constant 0 : i32
    %c0_i32_2 = arith.constant 0 : i32
    return %c0_i32, %c0_i32_0, %c0_i32_1 : i32, i32, i32
  }
  func.func @transform_3(%arg0: i32) -> (i32, i32) {
    %c0_i32 = arith.constant 0 : i32
    %c0_i32_0 = arith.constant 0 : i32
    %c0_i32_1 = arith.constant 0 : i32
    return %c0_i32, %c0_i32_0 : i32, i32
  }
  func.func @transform_4(%arg0: i32) -> (i32, i32) {
    %c0_i32 = arith.constant 0 : i32
    %c0_i32_0 = arith.constant 0 : i32
    %c0_i32_1 = arith.constant 0 : i32
    return %c0_i32, %c0_i32_0 : i32, i32
  }
  func.func @transform_5(%arg0: i32) -> (i32, i32, i32) {
    %c0_i32 = arith.constant 0 : i32
    %c0_i32_0 = arith.constant 0 : i32
    %c0_i32_1 = arith.constant 0 : i32
    %c0_i32_2 = arith.constant 0 : i32
    return %c0_i32, %c0_i32_0, %c0_i32_1 : i32, i32, i32
  }
  func.func @transform_6(%arg0: i32) -> (i32, i32) {
    %c0_i32 = arith.constant 0 : i32
    %c0_i32_0 = arith.constant 0 : i32
    %c0_i32_1 = arith.constant 0 : i32
    return %c0_i32, %c0_i32_0 : i32, i32
  }
  func.func @transform_7(%arg0: i32) -> (i32, i32, i32) {
    %c0_i32 = arith.constant 0 : i32
    %c0_i32_0 = arith.constant 0 : i32
    %c0_i32_1 = arith.constant 0 : i32
    %c0_i32_2 = arith.constant 0 : i32
    return %c0_i32, %c0_i32_0, %c0_i32_1 : i32, i32, i32
  }
  func.func @transform_8(%arg0: i32) -> (i32, i32) {
    %c0_i32 = arith.constant 0 : i32
    %c0_i32_0 = arith.constant 0 : i32
    %c0_i32_1 = arith.constant 0 : i32
    return %c0_i32, %c0_i32_0 : i32, i32
  }
  func.func @transform_9(%arg0: i32) -> (i32, i32, i32) {
    %c0_i32 = arith.constant 0 : i32
    %c0_i32_0 = arith.constant 0 : i32
    %c0_i32_1 = arith.constant 0 : i32
    %c0_i32_2 = arith.constant 0 : i32
    return %c0_i32, %c0_i32_0, %c0_i32_1 : i32, i32, i32
  }
  func.func @transform_10(%arg0: i32) -> (i32, i32) {
    %c0_i32 = arith.constant 0 : i32
    %c0_i32_0 = arith.constant 0 : i32
    %c0_i32_1 = arith.constant 0 : i32
    return %c0_i32, %c0_i32_0 : i32, i32
  }
  func.func @transform_11(%arg0: i32) -> (i32, i32) {
    %c0_i32 = arith.constant 0 : i32
    %c0_i32_0 = arith.constant 0 : i32
    %c0_i32_1 = arith.constant 0 : i32
    return %c0_i32, %c0_i32_0 : i32, i32
  }
  func.func @transform_12(%arg0: i32) -> (i32, i32, i32) {
    %c0_i32 = arith.constant 0 : i32
    %c0_i32_0 = arith.constant 0 : i32
    %c0_i32_1 = arith.constant 0 : i32
    %c0_i32_2 = arith.constant 0 : i32
    return %c0_i32, %c0_i32_0, %c0_i32_1 : i32, i32, i32
  }
  func.func @transform_13(%arg0: i32) -> (i32, i32) {
    %c0_i32 = arith.constant 0 : i32
    %c0_i32_0 = arith.constant 0 : i32
    %c0_i32_1 = arith.constant 0 : i32
    return %c0_i32, %c0_i32_0 : i32, i32
  }
  func.func @transform_14(%arg0: i32) -> (i32, i32, i32) {
    %c0_i32 = arith.constant 0 : i32
    %c0_i32_0 = arith.constant 0 : i32
    %c0_i32_1 = arith.constant 0 : i32
    %c0_i32_2 = arith.constant 0 : i32
    return %c0_i32, %c0_i32_0, %c0_i32_1 : i32, i32, i32
  }
  func.func @transform_15(%arg0: i32) -> (i32, i32) {
    %c0_i32 = arith.constant 0 : i32
    %c0_i32_0 = arith.constant 0 : i32
    %c0_i32_1 = arith.constant 0 : i32
    return %c0_i32, %c0_i32_0 : i32, i32
  }
  func.func @transform_16(%arg0: i32) -> (i32, i32, i32) {
    %c0_i32 = arith.constant 0 : i32
    %c0_i32_0 = arith.constant 0 : i32
    %c0_i32_1 = arith.constant 0 : i32
    %c0_i32_2 = arith.constant 0 : i32
    return %c0_i32, %c0_i32_0, %c0_i32_1 : i32, i32, i32
  }
  func.func @transform_17(%arg0: i32) -> (i32, i32) {
    %c0_i32 = arith.constant 0 : i32
    %c0_i32_0 = arith.constant 0 : i32
    %c0_i32_1 = arith.constant 0 : i32
    return %c0_i32, %c0_i32_0 : i32, i32
  }
  func.func @transform_18(%arg0: i32) -> (i32, i32) {
    %c0_i32 = arith.constant 0 : i32
    %c0_i32_0 = arith.constant 0 : i32
    %c0_i32_1 = arith.constant 0 : i32
    return %c0_i32, %c0_i32_0 : i32, i32
  }
  func.func @transform_19(%arg0: i32) -> (i32, i32) {
    %c0_i32 = arith.constant 0 : i32
    %c0_i32_0 = arith.constant 0 : i32
    %c0_i32_1 = arith.constant 0 : i32
    return %c0_i32, %c0_i32_0 : i32, i32
  }
  func.func @transform_20(%arg0: i32) -> (i32, i32, i32) {
    %c0_i32 = arith.constant 0 : i32
    %c0_i32_0 = arith.constant 0 : i32
    %c0_i32_1 = arith.constant 0 : i32
    return %arg0, %c0_i32, %c0_i32_0 : i32, i32, i32
  }
}

</mosaic_0001>

<bundles_post_ra>
// kernel: resnet_forward.1
= control target key start
LH: loop header
LB: loop body
LE: loop exit
PB: predicated region body
PF: predicated region fallthrough
CT: control target
= control target key end

     0   :  { %s3567_s0 = inlined_call_operand.vmem [shape: bf16[2,16,48], index: 0, kind: input, shape index: {}]   ;;  %s3568_s1 = inlined_call_operand.vmem [shape: f32[56,16], index: 1, kind: input, shape index: {}]   ;;  %s3569_s2 = inlined_call_operand.vmem [shape: bf16[7,48,128], index: 2, kind: input, shape index: {}]   ;;  %s3570_s3 = inlined_call_operand.vmem [shape: f32[1,128], index: 3, kind: input, shape index: {}]   ;;  %s3571_s4 = inlined_call_operand.vmem [shape: f32[24,8], index: 4, kind: input, shape index: {}]   ;;  %s3572_s5 = inlined_call_operand.vmem [shape: f32[3,128,64], index: 5, kind: input, shape index: {}]   ;;  %s3573_s6 = inlined_call_operand.vmem [shape: f32[24,8], index: 6, kind: input, shape index: {}]   ;;  %s3574_s7 = inlined_call_operand.vmem [shape: bf16[3,64,64], index: 7, kind: input, shape index: {}]   ;;  %s3575_s8 = inlined_call_operand.vmem [shape: f32[1,64], index: 8, kind: input, shape index: {}]   ;;  %s3576_s9 = inlined_call_operand.vmem [shape: bf16[3,64,64], index: 9, kind: input, shape index: {}]   ;;  %s3577_s10 = inlined_call_operand.vmem [shape: f32[1,64], index: 10, kind: input, shape index: {}]   ;;  %s3578_s11 = inlined_call_operand.vmem [shape: f32[24,8], index: 11, kind: input, shape index: {}]   ;;  %s3579_s12 = inlined_call_operand.vmem [shape: bf16[3,64,128], index: 12, kind: input, shape index: {}]   ;;  %s3580_s13 = inlined_call_operand.vmem [shape: f32[1,128], index: 13, kind: input, shape index: {}]   ;;  %s3581_s14 = inlined_call_operand.vmem [shape: f32[2,128,64], index: 14, kind: input, shape index: {}]   ;;  %s3582_s15 = inlined_call_operand.vmem [shape: f32[24,8], index: 15, kind: input, shape index: {}]   ;;  %s3583_s16 = inlined_call_operand.vmem [shape: bf16[3,64,64], index: 16, kind: input, shape index: {}]   ;;  %s3584_s17 = inlined_call_operand.vmem [shape: f32[1,64], index: 17, kind: input, shape index: {}]   ;;  %s3585_s18 = inlined_call_operand.vmem [shape: f32[1,8], index: 18, kind: input, shape index: {}]   ;;  %s3586_s19 = inlined_call_operand.vmem [shape: f32[64,32], index: 19, kind: input, shape index: {}]   ;;  %s3587_s20 = inlined_call_operand.hbm [shape: f32[2,1,32], index: 20, kind: output, shape index: {}]  }
   0x1   :  { %3598 = sst [smem:[#allocation11_spill]] %s3567_s0 }
   0x2   :  { %3599 = sst [smem:[#allocation12_spill]] %s3568_s1 }
   0x3   :  { %3600 = sst [smem:[#allocation13_spill]] %s3569_s2 }
   0x4   :  { %3601 = sst [smem:[#allocation14_spill]] %s3570_s3 }
   0x5   :  { %3602 = sst [smem:[#allocation15_spill]] %s3571_s4 }
   0x6   :  { %3603 = sst [smem:[#allocation16_spill]] %s3572_s5 }
   0x7   :  { %3604 = sst [smem:[#allocation17_spill]] %s3573_s6 }
   0x8   :  { %3605 = sst [smem:[#allocation18_spill]] %s3574_s7 }
   0x9   :  { %25 = vsyncpa [#allocation3], 0 }
   0xa   :  { %27 = vsyncpa [#allocation3 + $0x1], 0  ;;  %s2889_s1 = smov 0   ;;  %s2891_s22 = smov 0  }
   0xb   :  { %s2893_s23 = smov 0   ;;  %s2895_s24 = smov 0  }
   0xc LB: > { %3606 = sst [smem:[#allocation5_spill]] %s2770_s1  ;;  %s2910_s2 = sadd.s32 4294967295, %s2782_s24   ;;  %s2782_s24 = sphi %s2895_s24, %s3627_s24   ;;  %s2778_s23 = sphi %s2893_s23, %s3629_s23   ;;  %s2774_s22 = sphi %s2891_s22, %s3631_s22   ;;  %s2770_s1 = sphi %s2889_s1, %s3630_s1  }
   0xd   : > { %3607 = sst [smem:[#allocation6_spill]] %s2778_s23  ;;  %s2127_s25 = sadd.s32 4294967294, %s2782_s24  }
   0xe   : > { %3608 = sst [smem:[#allocation7_spill]] %s2782_s24  ;;  %s2914_s3 = sadd.s32 1, %s2782_s24  }
   0xf   : > { %3609 = sst [smem:[#allocation8_spill]] %s2914_s3  ;;  %s465_s26 = sadd.s32 1, %s2778_s23 }
  0x10   : > { %s462_s27 = ssub.s32 %s2782_s24, %s2914_s3  ;;  %p475_p0 = scmp.ne.s32.totalorder %s2778_s23, %s2774_s22 }
  0x11   : > { %p463_p1 = scmp.eq.s32.totalorder %s462_s27, 0  ;;  %p476_p2 = scmp.eq.s32.totalorder %s2910_s2, 1 }
  0x12   : > { %p481_p3 = scmp.ne.s32.totalorder %s2774_s22, %s2770_s1  ;;  %p482_p4 = scmp.eq.s32.totalorder %s2127_s25, 1 }
  0x13   : > { %s2925_s28 = scalar_select %p463_p1, %s2778_s23, %s465_s26  }
  0x14   : > { %p2927_p5 = por %p476_p2, %p475_p0  ;;  %p2931_p6 = por %p482_p4, %p481_p3 }
  0x15   : > { %3610 = sst [smem:[#allocation9_spill]] %s2925_s28  ;;  %p2130_p7 = scmp.ge.s32.totalorder %s2782_s24, 1 }
  0x16   : > { %s3612_s29 = scalar_select %p2931_p6, 1, 0 }
  0x17   : > { %p565_p8 = scmp.lt.s32.totalorder %s2782_s24, 3 }
  0x18   : > { %3613 = sst [smem:[#allocation10_spill]] %s3612_s29 }
  0x19   : > { %p566_p9 = pnand %p2130_p7, %p565_p8 }
  0x1a   : > { %p622_p10 = scmp.lt.s32.totalorder (!%p566_p9), %s2910_s2, 1  ;;  %s3614_s26 = sld [smem:[#allocation11_spill]] (!%p566_p9) }
  0x1b   : > { %569 = sbr.rel (%p566_p9) target bundleno = 2180 (0x884), region = 100  ;;  %s3615_s3 = sld [smem:[#allocation12_spill]] (!%p566_p9) }
  0x1c   : > { %s3616_s23 = sld [smem:[#allocation13_spill]] (!%p566_p9) }
  0x1d   : > { %s3618_s5 = sld [smem:[#allocation16_spill]] (!%p566_p9) }
  0x1e   : > { %s3619_s25 = sld [smem:[#allocation14_spill]] (!%p566_p9) }
  0x1f   : > { %s3622_s7 = sld [smem:[#allocation18_spill]] (!%p566_p9) }
  0x20   : > { %s623_s30 = scalar_select %p622_p10, %s2910_s2, 1  ;;  %vm639_vm0 = vcmask 130048   ;;  %vm732_vm1 = vcmask 392192   ;;  %vm1007_vm2 = vcmask 64512   ;;  %vm1238_vm3 = vcmask 523264  }
  0x21   : > { %v630_v3 = vld [vmem:[%s3615_s3] sm:$0xff]  ;;  %v631_v4 = vld [vmem:[%s3615_s3 + $0x8] sm:$0xff]  ;;  %v632_v5 = vld [vmem:[%s3615_s3 + $0x10] sm:$0xff]  ;;  %s3623_s6 = sld [smem:[#allocation17_spill]]  ;;  %vm2057_vm5 = vcmask 253952  }
  0x22   : > { %s2602_s0 = sshll.u32 %s623_s30, 3  ;;  %s3617_s28 = smov %s3616_s23  ;;  %v2605_v6 = vld [vmem:[%s3616_s23 + $0x10] sm:$0xff]  ;;  %v633_v8 = vld [vmem:[%s3615_s3 + $0x18] sm:$0xff]  ;;  %v634_v9 = vld [vmem:[%s3615_s3 + $0x20] sm:$0xff] }
  0x23   : > { %s626_s27 = scalar_lea.vmem %s3614_s26, %s2602_s0  ;;  %775 = vmatpush.bf16.msra.mxu2 %v2605_v6  ;;  %v2604_v7 = vld [vmem:[%s3617_s28 + $0x8] sm:$0xff]  ;;  %v636_v11 = vld [vmem:[%s3615_s3 + $0x30] sm:$0xff]  ;;  %v2603_v13 = vld [vmem:[%s3617_s28] sm:$0xff]  ;;  %s3620_s23 = sld [smem:[#allocation15_spill]] }
  0x24   : > { %v2673_v0 = vld [vmem:[%s626_s27] sm:$0xff]   ;;  %v635_v10 = vld [vmem:[%s3615_s3 + $0x28] sm:$0xff]  ;;  %v2606_v15 = vld [vmem:[%s3617_s28 + $0x18] sm:$0xff]  ;;  %s620_s3 = sand.u32 1, %s2774_s22   ;;  %s2068_s27 = scalar_lea.hbm %s3587_s20, %s2910_s2 }
  0x25   : > { %v2675_v1 = vunpack.c.h.bf16 %v2673_v0  ;;  %v2674_v2 = vunpack.c.l.bf16 %v2673_v0  ;;  %v2608_v12 = vld [vmem:[%s3617_s28 + $0x28] sm:$0xff]  ;;  %v2607_v14 = vld [vmem:[%s3617_s28 + $0x20] sm:$0xff]  ;;  %v2610_v17 = vld [vmem:[%s3617_s28 + $0x38] sm:$0xff]  ;;  %s621_s1 = scalar_lea.vmem [#allocation2], %s620_s3  ;;  %s2072_s30 = sshll.u32 %s2068_s27, 4  ;;  %s2073_s30 = int_to_ptr.hbm [resolvable:$true] %s2072_s30 }
  0x26   : > { %741 = vmatpush.bf16.msra.mxu1 %v2608_v12  ;;  %v2611_v16 = vld [vmem:[%s3617_s28 + $0x40] sm:$0xff]  ;;  %v2609_v18 = vld [vmem:[%s3617_s28 + $0x30] sm:$0xff]  ;;  %v2614_v19 = vld [vmem:[%s3617_s28 + $0x58] sm:$0xff]  ;;  %s2070_s29 = sshll.u32 %s621_s1, 4  ;;  %s2060_s0 = scalar_lea.sflag [#allocation3], %s620_s3  ;;  %s2071_s29 = int_to_ptr.vmem [resolvable:$true] %s2070_s29 }
  0x27   : > { %675 = vmatpush.msra.mxu0 %v2675_v1  ;;  %776 = vmatpush.bf16.msra.mxu2 %v2604_v7  ;;  %v2613_v20 = vld [vmem:[%s3617_s28 + $0x50] sm:$0xff]  ;;  %v2612_v21 = vld [vmem:[%s3617_s28 + $0x48] sm:$0xff]  ;;  %v2615_v24 = vld [vmem:[%s3617_s28 + $0x60] sm:$0xff]  ;;  %s2734_s21 = sshra.s32 %s2073_s30, 4  ;;  %s2740_s2 = scalar_lea.hbm %s3587_s20, 2  ;;  %s2735_s21 = int_to_ptr.hbm [resolvable:$true] %s2734_s21 }
  0x28   : > { %817 = vmatpush.bf16.msra.mxu3 %v2611_v16  ;;  %v2617_v22 = vld [vmem:[%s3617_s28 + $0x70] sm:$0xff]  ;;  %v2616_v23 = vld [vmem:[%s3617_s28 + $0x68] sm:$0xff]  ;;  %v2619_v28 = vld [vmem:[%s3617_s28 + $0x80] sm:$0xff]  ;;  %p2741_p0 = scmp.lt.s32.totalorder %s2735_s21, %s3587_s20 }
  0x29   : > { %676 = vmatpush.msra.mxu0 %v2674_v2  ;;  %v2620_v25 = vld [vmem:[%s3617_s28 + $0x88] sm:$0xff]  ;;  %v2618_v29 = vld [vmem:[%s3617_s28 + $0x78] sm:$0xff]  ;;  %v2623_v31 = vld [vmem:[%s3617_s28 + $0xa0] sm:$0xff]  ;;  %s3621_s26 = smov %s3620_s23 }
  0x2a   : > { %2133 = vmatmul.msk.f32.vlgmr.msra.gmra.mxu0 %vm639_vm0, %v630_v3  ;;  %742 = vmatpush.bf16.msra.mxu1 %v2607_v14  ;;  %v2622_v33 = vld [vmem:[%s3617_s28 + $0x98] sm:$0xff]  ;;  %v2621_v35 = vld [vmem:[%s3617_s28 + $0x90] sm:$0xff]  ;;  %v1058_v62 = vld [vmem:[%s3618_s5 + $0x68] sm:$0xff] }
  0x2b   : > { %777 = vmatpush.bf16.msra.mxu2 %v2603_v13  ;;  %v1060_v56 = vld [vmem:[%s3618_s5 + $0x78] sm:$0xff]  ;;  %v1059_v57 = vld [vmem:[%s3618_s5 + $0x70] sm:$0xff]  ;;  %v2283_v63 = vld [vmem:[%s3618_s5 + $0xe8] sm:$0xff] }
  0x2c   : > { %818 = vmatpush.bf16.msra.mxu3 %v2610_v17  ;;  %v2285_v58 = vld [vmem:[%s3618_s5 + $0xf8] sm:$0xff]  ;;  %1061 = vmatpush.msrb.mxu0 %v1060_v56  ;;  %v2284_v60 = vld [vmem:[%s3618_s5 + $0xf0] sm:$0xff]  ;;  %v2299_v1 = vld [vmem:[%s3618_s5 + $0x168] sm:$0xff] }
  0x2d   : > { %v2301_v59 = vld [vmem:[%s3618_s5 + $0x178] sm:$0xff]  ;;  %v2300_v61 = vld [vmem:[%s3618_s5 + $0x170] sm:$0xff]  ;;  %v1057_v2 = vld [vmem:[%s3618_s5 + $0x60] sm:$0xff] }
  0x2e   : > { %743 = vmatpush.bf16.msra.mxu1 %v2606_v15  ;;  %1062 = vmatpush.msrb.mxu0 %v1059_v57  ;;  %v2282_v3 = vld [vmem:[%s3618_s5 + $0xe0] sm:$0xff]  ;;  %v2297_v12 = vld [vmem:[%s3618_s5 + $0x158] sm:$0xff]  ;;  %v1055_v14 = vld [vmem:[%s3618_s5 + $0x50] sm:$0xff] }
  0x2f   : > { %903 = vmatpush.bf16.msrb.mxu2 %v2617_v22  ;;  %v2280_v15 = vld [vmem:[%s3618_s5 + $0xd0] sm:$0xff] }
  0x30   : > { %819 = vmatpush.bf16.msra.mxu3 %v2609_v18  ;;  %1063 = vmatpush.msrb.mxu0 %v1058_v62  ;;  %v2296_v17 = vld [vmem:[%s3618_s5 + $0x150] sm:$0xff] }
  0x31   : > { %v2626_v62 = vld [vmem:[%s3622_s7 + $0x10] sm:$0xff] }
  0x32   : > { %2134 = vmatmul.msk.f32.gmra.mxu0 %vm639_vm0, %v631_v4  ;;  %860 = vmatpush.bf16.msrb.mxu1 %v2614_v19 }
  0x33   : > { %904 = vmatpush.bf16.msrb.mxu2 %v2616_v23  ;;  %1064 = vmatpush.msrb.mxu0 %v1057_v2  ;;  %v1005_v23 = vld [vmem:[%s3621_s26 + $0x8] sm:$0xff] }
  0x34   : > { %946 = vmatpush.bf16.msrb.mxu3 %v2620_v25  ;;  %v1054_v25 = vld [vmem:[%s3618_s5 + $0x48] sm:$0xff] }
  0x36   : > { %861 = vmatpush.bf16.msrb.mxu1 %v2613_v20  ;;  %v1004_v20 = vld [vmem:[%s3620_s23] sm:$0xff] }
  0x37   : > { %905 = vmatpush.bf16.msrb.mxu2 %v2615_v24  ;;  %v1006_v24 = vld [vmem:[%s3621_s26 + $0x10] sm:$0xff] }
  0x38   : > { %947 = vmatpush.bf16.msrb.mxu3 %v2619_v28  ;;  %v1053_v28 = vld [vmem:[%s3618_s5 + $0x40] sm:$0xff] }
  0x3a   : > { %2135 = vmatmul.msk.f32.gmra.mxu0 %vm639_vm0, %v632_v5  ;;  %862 = vmatpush.bf16.msrb.mxu1 %v2612_v21  ;;  %v2298_v5 = vld [vmem:[%s3618_s5 + $0x160] sm:$0xff] }
  0x3c   : > { %948 = vmatpush.bf16.msrb.mxu3 %v2618_v29  ;;  %v2278_v29 = vld [vmem:[%s3618_s5 + $0xc0] sm:$0xff] }
  0x42   : > { %2136 = vmatmul.msk.f32.gmra.mxu0 %vm639_vm0, %v633_v8  ;;  %v1056_v8 = vld [vmem:[%s3618_s5 + $0x58] sm:$0xff] }
  0x43   : > { %1065 = vmatpush.msrb.mxu0 %v1056_v8  ;;  %v2630_v8 = vld [vmem:[%s3622_s7 + $0x30] sm:$0xff] }
  0x45   : > { %1066 = vmatpush.msrb.mxu0 %v1055_v14  ;;  %v2633_v14 = vld [vmem:[%s3622_s7 + $0x48] sm:$0xff] }
  0x47   : > { %1067 = vmatpush.msrb.mxu0 %v1054_v25 }
  0x49   : > { %1068 = vmatpush.msrb.mxu0 %v1053_v28  ;;  %v2638_v28 = vld [vmem:[%s3576_s9 + $0x10] sm:$0xff] }
  0x4a   : > { %2137 = vmatmul.msk.f32.gmra.mxu0 %vm639_vm0, %v634_v9  ;;  %v2281_v9 = vld [vmem:[%s3618_s5 + $0xd8] sm:$0xff] }
  0x52   : > { %2138 = vmatmul.msk.f32.gmra.mxu0 %vm639_vm0, %v635_v10 }
  0x5a   : > { %2139 = vmatmul.msk.f32.gmra.mxu0 %vm639_vm0, %v636_v11  ;;  %v2715_v11 = vld [vmem:[%s3619_s25] ss:$0 sm:$0xff]  ;;  %s2736_s25 = scalar_lea.hbm %s2735_s21, 1 }
  0x5b   : > { %p2737_p11 = scmp.ne.s32.totalorder %s2735_s21, %s2736_s25  ;;  %p2742_p1 = scmp.lt.s32.totalorder %s2740_s2, %s2736_s25 }
  0x5d   : > { %p2738_p12 = pnand %p2737_p11, %p2927_p5  ;;  %p2743_p2 = por %p2742_p1, %p2741_p0 }
  0x5f   : > { %p2739_p13 = pneg %p2738_p12 }
  0x61   : > { %p2744_p3 = pnand %p2743_p2, %p2739_p13 }
  0xa7   : > { %v678_v26 = vpop.f32.mrf.mxu0 }
  0xa8   : > { %v699_v27 = vpack.c.bf16 %v678_v26, %v678_v26  ;;  %v2279_v26 = vld [vmem:[%s3618_s5 + $0xc8] sm:$0xff] }
  0xaa   : > { %2171 = vmatmul.msk.bf16.vlgmr.msra.gmra.mxu2 %vm732_vm1, %v699_v27  ;;  %v2295_v27 = vld [vmem:[%s3618_s5 + $0x148] sm:$0xff] }
  0xaf   : > { %v681_v30 = vpop.f32.mrf.mxu0 }
  0xb0   : > { %v706_v32 = vpack.c.bf16 %v681_v30, %v681_v30  ;;  %v2294_v30 = vld [vmem:[%s3618_s5 + $0x140] sm:$0xff] }
  0xb2   : > { %2158 = vmatmul.msk.bf16.vlgmr.msra.gmra.mxu1 %vm732_vm1, %v706_v32  ;;  %v2277_v32 = vld [vmem:[%s3618_s5 + $0xb8] sm:$0xff] }
  0xb3   : > { %989 = vmatpush.bf16.msra.mxu1 %v2623_v31  ;;  %v1052_v31 = vld [vmem:[%s3618_s5 + $0x38] sm:$0xff] }
  0xb4   : > { %1069 = vmatpush.msrb.mxu0 %v1052_v31  ;;  %v2716_v31 = vld [vmem:[%s3575_s8] ss:$0 sm:$0xff] }
  0xb7   : > { %v684_v34 = vpop.f32.mrf.mxu0  ;;  %990 = vmatpush.bf16.msra.mxu1 %v2622_v33  ;;  %v2293_v33 = vld [vmem:[%s3618_s5 + $0x138] sm:$0xff] }
  0xb8   : > { %v783_v36 = vpack.c.bf16 %v684_v34, %v684_v34  ;;  %v1051_v34 = vld [vmem:[%s3618_s5 + $0x30] sm:$0xff] }
  0xb9   : > { %1070 = vmatpush.msrb.mxu0 %v1051_v34 }
  0xba   : > { %2190 = vmatmul.msk.bf16.vlgmr.msra.gmra.mxu3 %vm732_vm1, %v783_v36  ;;  %v2292_v36 = vld [vmem:[%s3618_s5 + $0x130] sm:$0xff] }
  0xbb   : > { %991 = vmatpush.bf16.msra.mxu1 %v2621_v35  ;;  %1098 = vmatpush.msra.mxu3 %v2285_v58  ;;  %v2276_v35 = vld [vmem:[%s3618_s5 + $0xb0] sm:$0xff] }
  0xbd   : > { %1099 = vmatpush.msra.mxu3 %v2284_v60  ;;  %v2627_v60 = vld [vmem:[%s3622_s7 + $0x18] sm:$0xff] }
  0xbf   : > { %v687_v37 = vpop.f32.mrf.mxu0  ;;  %1100 = vmatpush.msra.mxu3 %v2283_v63  ;;  %v2625_v63 = vld [vmem:[%s3622_s7 + $0x8] sm:$0xff] }
  0xc0   : > { %v826_v38 = vpack.c.bf16 %v687_v37, %v687_v37  ;;  %v1050_v37 = vld [vmem:[%s3618_s5 + $0x28] sm:$0xff] }
  0xc1   : > { %1101 = vmatpush.msra.mxu3 %v2282_v3  ;;  %1071 = vmatpush.msrb.mxu0 %v1050_v37  ;;  %v2642_v37 = vld [vmem:[%s3576_s9 + $0x30] sm:$0xff] }
  0xc2   : > { %2209 = vmatmul.msk.bf16.vlgmr.msrb.gmra.mxu1 %vm732_vm1, %v826_v38  ;;  %v2275_v38 = vld [vmem:[%s3618_s5 + $0xa8] sm:$0xff] }
  0xc3   : > { %1136 = vmatpush.msrb.mxu1 %v2301_v59  ;;  %1102 = vmatpush.msra.mxu3 %v2281_v9  ;;  %v2624_v9 = vld [vmem:[%s3622_s7] sm:$0xff] }
  0xc5   : > { %1137 = vmatpush.msrb.mxu1 %v2300_v61  ;;  %1103 = vmatpush.msra.mxu3 %v2280_v15  ;;  %v2631_v61 = vld [vmem:[%s3622_s7 + $0x38] sm:$0xff]  ;;  %v2632_v15 = vld [vmem:[%s3622_s7 + $0x40] sm:$0xff] }
  0xc7   : > { %v690_v39 = vpop.f32.mrf.mxu0  ;;  %1138 = vmatpush.msrb.mxu1 %v2299_v1  ;;  %1104 = vmatpush.msra.mxu3 %v2279_v26  ;;  %v2639_v26 = vld [vmem:[%s3576_s9 + $0x18] sm:$0xff] }
  0xc8   : > { %v869_v40 = vpack.c.bf16 %v690_v39, %v690_v39  ;;  %v2291_v39 = vld [vmem:[%s3618_s5 + $0x128] sm:$0xff] }
  0xc9   : > { %1139 = vmatpush.msrb.mxu1 %v2298_v5  ;;  %1105 = vmatpush.msra.mxu3 %v2278_v29  ;;  %v1157_v5 = vld [vmem:[%s3623_s6] sm:$0xff]  ;;  %v2637_v29 = vld [vmem:[%s3576_s9 + $0x8] sm:$0xff] }
  0xca   : > { %2228 = vmatmul.msk.bf16.vlgmr.msrb.gmra.mxu2 %vm732_vm1, %v869_v40  ;;  %v1049_v40 = vld [vmem:[%s3618_s5 + $0x20] sm:$0xff] }
  0xcb   : > { %1140 = vmatpush.msrb.mxu1 %v2297_v12  ;;  %1106 = vmatpush.msra.mxu3 %v2277_v32  ;;  %v2635_v12 = vld [vmem:[%s3622_s7 + $0x58] sm:$0xff] }
  0xcc   : > { %1072 = vmatpush.msrb.mxu0 %v1049_v40  ;;  %v2647_v40 = vld [vmem:[%s3576_s9 + $0x58] sm:$0xff] }
  0xcd   : > { %1141 = vmatpush.msrb.mxu1 %v2296_v17  ;;  %1107 = vmatpush.msra.mxu3 %v2276_v35 }
  0xcf   : > { %v693_v41 = vpop.f32.mrf.mxu0  ;;  %1142 = vmatpush.msrb.mxu1 %v2295_v27  ;;  %1108 = vmatpush.msra.mxu3 %v2275_v38  ;;  %v2643_v27 = vld [vmem:[%s3576_s9 + $0x38] sm:$0xff]  ;;  %v2636_v38 = vld [vmem:[%s3576_s9] sm:$0xff] }
  0xd0   : > { %v912_v42 = vpack.c.bf16 %v693_v41, %v693_v41  ;;  %v2274_v41 = vld [vmem:[%s3618_s5 + $0xa0] sm:$0xff] }
  0xd1   : > { %1143 = vmatpush.msrb.mxu1 %v2294_v30  ;;  %1109 = vmatpush.msra.mxu3 %v2274_v41  ;;  %v2640_v41 = vld [vmem:[%s3576_s9 + $0x20] sm:$0xff] }
  0xd2   : > { %2247 = vmatmul.msk.bf16.vlgmr.msrb.gmra.mxu3 %vm732_vm1, %v912_v42  ;;  %v2290_v42 = vld [vmem:[%s3618_s5 + $0x120] sm:$0xff] }
  0xd3   : > { %1144 = vmatpush.msrb.mxu1 %v2293_v33 }
  0xd5   : > { %1145 = vmatpush.msrb.mxu1 %v2292_v36 }
  0xd7   : > { %v696_v43 = vpop.f32.mrf.mxu0  ;;  %1146 = vmatpush.msrb.mxu1 %v2291_v39  ;;  %v2641_v39 = vld [vmem:[%s3576_s9 + $0x28] sm:$0xff] }
  0xd8   : > { %v955_v44 = vpack.c.bf16 %v696_v43, %v696_v43  ;;  %v1048_v43 = vld [vmem:[%s3618_s5 + $0x18] sm:$0xff] }
  0xd9   : > { %1147 = vmatpush.msrb.mxu1 %v2290_v42  ;;  %1073 = vmatpush.msrb.mxu0 %v1048_v43  ;;  %v2646_v42 = vld [vmem:[%s3576_s9 + $0x50] sm:$0xff]  ;;  %v2645_v43 = vld [vmem:[%s3576_s9 + $0x48] sm:$0xff] }
  0xda   : > { %2266 = vmatmul.msk.bf16.vlgmr.msra.gmra.mxu1 %vm732_vm1, %v955_v44  ;;  %v2273_v44 = vld [vmem:[%s3618_s5 + $0x98] sm:$0xff] }
  0xdb   : > { %1110 = vmatpush.msra.mxu3 %v2273_v44  ;;  %v2644_v44 = vld [vmem:[%s3576_s9 + $0x40] sm:$0xff] }
 0x12d   : > { %v779_v45 = vpop.f32.mrf.mxu2 }
 0x12f   : > { %v745_v46 = vpop.f32.mrf.mxu1 }
 0x130   : > { %v780_v53 = vadd.f32 %v779_v45, %v745_v46  ;;  %v2289_v45 = vld [vmem:[%s3618_s5 + $0x118] sm:$0xff]  ;;  %v1047_v46 = vld [vmem:[%s3618_s5 + $0x10] sm:$0xff] }
 0x131   : > { %1148 = vmatpush.msrb.mxu1 %v2289_v45  ;;  %1074 = vmatpush.msrb.mxu0 %v1047_v46 }
 0x135   : > { %v781_v47 = vpop.f32.mrf.mxu2 }
 0x136   : > { %v2272_v47 = vld [vmem:[%s3618_s5 + $0x90] sm:$0xff] }
 0x137   : > { %v747_v48 = vpop.f32.mrf.mxu1  ;;  %1111 = vmatpush.msra.mxu3 %v2272_v47 }
 0x138   : > { %v2288_v48 = vld [vmem:[%s3618_s5 + $0x110] sm:$0xff] }
 0x139   : > { %1149 = vmatpush.msrb.mxu1 %v2288_v48 }
 0x13d   : > { %v821_v49 = vpop.f32.mrf.mxu3 }
 0x13e   : > { %v825_v55 = vadd.f32 %v821_v49, %v780_v53  ;;  %v1046_v49 = vld [vmem:[%s3618_s5 + $0x8] sm:$0xff]  ;;  %v2270_v53 = vld [vmem:[%s3618_s5 + $0x80] sm:$0xff] }
 0x13f   : > { %v864_v50 = vpop.f32.mrf.mxu1  ;;  %1075 = vmatpush.msrb.mxu0 %v1046_v49 }
 0x140   : > { %v868_v0 = vadd.f32 %v864_v50, %v825_v55  ;;  %v2271_v50 = vld [vmem:[%s3618_s5 + $0x88] sm:$0xff] }
 0x141   : > { %1112 = vmatpush.msra.mxu3 %v2271_v50 }
 0x143   : > { %1113 = vmatpush.msra.mxu3 %v2270_v53 }
 0x145   : > { %v823_v51 = vpop.f32.mrf.mxu3  ;;  %1286 = vmatpush.bf16.msrb.mxu3 %v2627_v60 }
 0x146   : > { %v2287_v51 = vld [vmem:[%s3618_s5 + $0x108] sm:$0xff] }
 0x147   : > { %v866_v52 = vpop.f32.mrf.mxu1  ;;  %1150 = vmatpush.msrb.mxu1 %v2287_v51 }
 0x148   : > { %v1045_v52 = vld [vmem:[%s3618_s5] sm:$0xff] }
 0x149   : > { %1076 = vmatpush.msrb.mxu0 %v1045_v52  ;;  %1287 = vmatpush.bf16.msrb.mxu3 %v2626_v62 }
 0x14d   : > { %v907_v54 = vpop.f32.mrf.mxu2  ;;  %1288 = vmatpush.bf16.msrb.mxu3 %v2625_v63 }
 0x14e   : > { %v911_v4 = vadd.f32 %v907_v54, %v868_v0  ;;  %v2286_v54 = vld [vmem:[%s3618_s5 + $0x100] sm:$0xff] }
 0x14f   : > { %1151 = vmatpush.msrb.mxu1 %v2286_v54 }
 0x151   : > { %1289 = vmatpush.bf16.msrb.mxu3 %v2624_v9  ;;  %v2659_v9 = vld [vmem:[%s3579_s12 + $0x58] sm:$0xff] }
 0x155   : > { %v909_v6 = vpop.f32.mrf.mxu2  ;;  %v950_v7 = vpop.f32.mrf.mxu3 }
 0x156   : > { %v954_v10 = vadd.f32 %v950_v7, %v911_v4  ;;  %v1158_v6 = vld [vmem:[%s3623_s6 + $0x8] sm:$0xff]  ;;  %v1159_v7 = vld [vmem:[%s3623_s6 + $0x10] sm:$0xff] }
 0x157   : > { %v993_v13 = vpop.f32.mrf.mxu1 }
 0x158   : > { %v997_v16 = vadd.f32 %v993_v13, %v954_v10  ;;  %v2629_v10 = vld [vmem:[%s3622_s7 + $0x28] sm:$0xff]  ;;  %v2634_v13 = vld [vmem:[%s3622_s7 + $0x50] sm:$0xff] }
 0x15a   : > { %v1002_v18 = vadd.f32 %v2715_v11, %v997_v16  ;;  %v2628_v11 = vld [vmem:[%s3622_s7 + $0x20] sm:$0xff] }
 0x15c   : > { %v1003_v19 = vmax.f32 %v1002_v18, 0.0 }
 0x15d   : > { %v952_v21 = vpop.f32.mrf.mxu3 }
 0x15e   : > { %1032 = vmatpush.msra.mxu2 %v1003_v19 }
 0x15f   : > { %v995_v22 = vpop.f32.mrf.mxu1  ;;  %2267 = vmatmul.msk.f32.vlgmr.msra.gmra.mxu2 %vm1007_vm2, %v1004_v20 }
 0x160   : > { %1246 = vmatpush.bf16.msrb.mxu2 %v2631_v61  ;;  %v2649_v61 = vld [vmem:[%s3579_s12 + $0x8] sm:$0xff] }
 0x164   : > { %1247 = vmatpush.bf16.msrb.mxu2 %v2630_v8  ;;  %v2653_v8 = vld [vmem:[%s3579_s12 + $0x28] sm:$0xff] }
 0x167   : > { %2268 = vmatmul.msk.f32.gmra.mxu2 %vm1007_vm2, %v1005_v23 }
 0x168   : > { %1248 = vmatpush.bf16.msrb.mxu2 %v2629_v10  ;;  %v2652_v10 = vld [vmem:[%s3579_s12 + $0x20] sm:$0xff] }
 0x16c   : > { %1249 = vmatpush.bf16.msrb.mxu2 %v2628_v11  ;;  %v2658_v11 = vld [vmem:[%s3579_s12 + $0x50] sm:$0xff] }
 0x16f   : > { %2269 = vmatmul.msk.f32.gmra.mxu2 %vm1007_vm2, %v1006_v24 }
 0x170   : > { %1336 = vmatpush.bf16.msra.mxu2 %v2635_v12  ;;  %v2657_v12 = vld [vmem:[%s3579_s12 + $0x48] sm:$0xff] }
 0x174   : > { %1337 = vmatpush.bf16.msra.mxu2 %v2634_v13  ;;  %v2656_v13 = vld [vmem:[%s3579_s12 + $0x40] sm:$0xff] }
 0x178   : > { %1338 = vmatpush.bf16.msra.mxu2 %v2633_v14  ;;  %v1749_v14 = vld [vmem:[%s3581_s14 + $0x78] sm:$0xff] }
 0x17c   : > { %1339 = vmatpush.bf16.msra.mxu2 %v2632_v15  ;;  %v2527_v15 = vld [vmem:[%s3581_s14 + $0xf8] sm:$0xff] }
 0x1e2   : > { %v1034_v55 = vpop.f32.mrf.mxu2 }
 0x1ea   : > { %v1037_v56 = vpop.f32.mrf.mxu2 }
 0x1eb   : > { %v1043_v57 = vmax.f32 %v1034_v55, %v1037_v56  ;;  %v2651_v55 = vld [vmem:[%s3579_s12 + $0x18] sm:$0xff] }
 0x1ec   : > { %v2655_v56 = vld [vmem:[%s3579_s12 + $0x38] sm:$0xff] }
 0x1f2   : > { %v1040_v58 = vpop.f32.mrf.mxu2 }
 0x1f3   : > { %v1044_v59 = vmax.f32 %v1043_v57, %v1040_v58  ;;  %v2650_v57 = vld [vmem:[%s3579_s12 + $0x10] sm:$0xff] }
 0x1f5   : > { %1077 = vmatmul.f32.vlgmr.msrb.gmra.mxu0 %v1044_v59  ;;  %1114 = vmatmul.f32.vlgmr.msra.gmra.mxu3 %v1044_v59 }
 0x1f6   : > { %1152 = vmatmul.f32.vlgmr.msrb.gmra.mxu1 %v1044_v59  ;;  %1468 = vmatpush.bf16.msra.mxu3 %v2639_v26  ;;  %v2717_v59 = vld [vmem:[%s3577_s10] ss:$0 sm:$0xff] }
 0x1fa   : > { %1469 = vmatpush.bf16.msra.mxu3 %v2638_v28  ;;  %v1745_v28 = vld [vmem:[%s3581_s14 + $0x58] sm:$0xff] }
 0x1fe   : > { %1470 = vmatpush.bf16.msra.mxu3 %v2637_v29  ;;  %v2523_v29 = vld [vmem:[%s3581_s14 + $0xd8] sm:$0xff] }
 0x202   : > { %1471 = vmatpush.bf16.msra.mxu3 %v2636_v38  ;;  %v1740_v38 = vld [vmem:[%s3581_s14 + $0x30] sm:$0xff] }
 0x272   : > { %v1078_v0 = vpop.f32.mrf.mxu0 }
 0x273   : > { %v1153_v3 = vpop.f32.mrf.mxu1 }
 0x278   : > { %v1115_v1 = vpop.f32.mrf.mxu3 }
 0x279   : > { %v1118_v2 = vmax.f32 %v1078_v0, %v1115_v1 }
 0x27b   : > { %v3211_v4 = vmax.f32 %v1118_v2, %v1153_v3  ;;  %v1535_v2 = vld [vmem:[%s3578_s11] sm:$0xff] }
 0x27d   : > { %1184 = vmatpush.msra.mxu0 %v3211_v4 }
 0x27e   : > { %2302 = vmatmul.msk.f32.vlgmr.msra.gmra.mxu0 %vm1007_vm2, %v1157_v5 }
 0x27f   : > { %1428 = vmatpush.bf16.msrb.mxu0 %v2643_v27 }
 0x283   : > { %1429 = vmatpush.bf16.msrb.mxu0 %v2642_v37  ;;  %v2519_v37 = vld [vmem:[%s3581_s14 + $0xb8] sm:$0xff] }
 0x286   : > { %2303 = vmatmul.msk.f32.gmra.mxu0 %vm1007_vm2, %v1158_v6 }
 0x287   : > { %1430 = vmatpush.bf16.msrb.mxu0 %v2641_v39  ;;  %v2518_v39 = vld [vmem:[%s3581_s14 + $0xb0] sm:$0xff] }
 0x28b   : > { %1431 = vmatpush.bf16.msrb.mxu0 %v2640_v41  ;;  %v2517_v41 = vld [vmem:[%s3581_s14 + $0xa8] sm:$0xff] }
 0x28e   : > { %2304 = vmatmul.msk.f32.gmra.mxu0 %vm1007_vm2, %v1159_v7 }
 0x2fb   : > { %v1186_v16 = vpop.f32.mrf.mxu0 }
 0x2fc   : > { %v1195_v17 = vpack.c.bf16 %v1186_v16, %v1186_v16  ;;  %v1748_v16 = vld [vmem:[%s3581_s14 + $0x70] sm:$0xff] }
 0x2fe   : > { %2346 = vmatmul.msk.bf16.vlgmr.msrb.gmra.mxu3 %vm1238_vm3, %v1195_v17  ;;  %v2526_v17 = vld [vmem:[%s3581_s14 + $0xf0] sm:$0xff] }
 0x2ff   : > { %1663 = vmatpush.bf16.msrb.mxu3 %v2651_v55  ;;  %v1728_v55 = vlaneseq }
 0x303   : > { %v1189_v18 = vpop.f32.mrf.mxu0  ;;  %1664 = vmatpush.bf16.msrb.mxu3 %v2650_v57  ;;  %v1729_v57 = vand.u32 127, %v1728_v55 }
 0x304   : > { %v1204_v19 = vpack.c.bf16 %v1189_v18, %v1189_v18  ;;  %v1747_v18 = vld [vmem:[%s3581_s14 + $0x68] sm:$0xff] }
 0x306   : > { %2329 = vmatmul.msk.bf16.vlgmr.msrb.gmra.mxu2 %vm1238_vm3, %v1204_v19  ;;  %v2525_v19 = vld [vmem:[%s3581_s14 + $0xe8] sm:$0xff] }
 0x307   : > { %1518 = vmatpush.bf16.msrb.mxu2 %v2647_v40  ;;  %1665 = vmatpush.bf16.msrb.mxu3 %v2649_v61  ;;  %v1739_v40 = vld [vmem:[%s3581_s14 + $0x28] sm:$0xff]  ;;  %v1730_v61 = vand.u32 63, %v1729_v57 }
 0x309   : > { %vm1731_vm4 = vcmp.lt.s32.totalorder %v1730_v61, 32 }
 0x30b   : > { %v1192_v20 = vpop.f32.mrf.mxu0  ;;  %1519 = vmatpush.bf16.msrb.mxu2 %v2646_v42  ;;  %v1738_v42 = vld [vmem:[%s3581_s14 + $0x20] sm:$0xff] }
 0x30c   : > { %v1295_v21 = vpack.c.bf16 %v1192_v20, %v1192_v20  ;;  %v1746_v20 = vld [vmem:[%s3581_s14 + $0x60] sm:$0xff] }
 0x30f   : > { %1520 = vmatpush.bf16.msrb.mxu2 %v2645_v43  ;;  %v2516_v43 = vld [vmem:[%s3581_s14 + $0xa0] sm:$0xff] }
 0x313   : > { %1521 = vmatpush.bf16.msrb.mxu2 %v2644_v44  ;;  %v1737_v44 = vld [vmem:[%s3581_s14 + $0x18] sm:$0xff] }
 0x316   : > { %2371 = vmatmul.msk.bf16.vlgmr.msra.gmra.mxu2 %vm1238_vm3, %v1295_v21  ;;  %v2524_v21 = vld [vmem:[%s3581_s14 + $0xe0] sm:$0xff] }
 0x317   : > { %1713 = vmatpush.bf16.msra.mxu2 %v2659_v9  ;;  %v2665_v9 = vld [vmem:[%s3583_s16 + $0x28] sm:$0xff] }
 0x31b   : > { %1714 = vmatpush.bf16.msra.mxu2 %v2658_v11  ;;  %v2664_v11 = vld [vmem:[%s3583_s16 + $0x20] sm:$0xff] }
 0x31f   : > { %1715 = vmatpush.bf16.msra.mxu2 %v2657_v12  ;;  %v2670_v12 = vld [vmem:[%s3583_s16 + $0x50] sm:$0xff] }
 0x323   : > { %1716 = vmatpush.bf16.msra.mxu2 %v2656_v13  ;;  %v2663_v13 = vld [vmem:[%s3583_s16 + $0x18] sm:$0xff] }
 0x381   : > { %v1291_v22 = vpop.f32.mrf.mxu3 }
 0x389   : > { %v1251_v23 = vpop.f32.mrf.mxu2  ;;  %v1293_v24 = vpop.f32.mrf.mxu3 }
 0x38a   : > { %v1292_v30 = vadd.f32 %v1291_v22, %v1251_v23 }
 0x391   : > { %v1253_v25 = vpop.f32.mrf.mxu2 }
 0x399   : > { %v1341_v32 = vpop.f32.mrf.mxu2 }
 0x39a   : > { %v1345_v33 = vadd.f32 %v1341_v32, %v1292_v30  ;;  %v1744_v30 = vld [vmem:[%s3581_s14 + $0x50] sm:$0xff]  ;;  %v1743_v32 = vld [vmem:[%s3581_s14 + $0x48] sm:$0xff] }
 0x39c   : > { %v1350_v34 = vadd.f32 %v2716_v31, %v1345_v33  ;;  %v2522_v31 = vld [vmem:[%s3581_s14 + $0xd0] sm:$0xff]  ;;  %v2521_v33 = vld [vmem:[%s3581_s14 + $0xc8] sm:$0xff] }
 0x39e   : > { %v1351_v35 = vmax.f32 %v1350_v34, 0.0  ;;  %v1742_v34 = vld [vmem:[%s3581_s14 + $0x40] sm:$0xff] }
 0x3a0   : > { %1367 = vmatpush.msra.mxu1 %v1351_v35  ;;  %v2520_v35 = vld [vmem:[%s3581_s14 + $0xc0] sm:$0xff] }
 0x3a1   : > { %v1343_v36 = vpop.f32.mrf.mxu2  ;;  %2372 = vmatmul.msk.f32.vlgmr.msra.gmra.mxu1 %vm1007_vm2, %v1157_v5  ;;  %v1536_v5 = vld [vmem:[%s3578_s11 + $0x8] sm:$0xff] }
 0x3a2   : > { %1623 = vmatpush.bf16.msrb.mxu1 %v2655_v56  ;;  %v1741_v36 = vld [vmem:[%s3581_s14 + $0x38] sm:$0xff] }
 0x3a9   : > { %2373 = vmatmul.msk.f32.gmra.mxu1 %vm1007_vm2, %v1158_v6  ;;  %v1537_v6 = vld [vmem:[%s3578_s11 + $0x10] sm:$0xff] }
 0x3b1   : > { %2374 = vmatmul.msk.f32.gmra.mxu1 %vm1007_vm2, %v1159_v7  ;;  %v2648_v7 = vld [vmem:[%s3579_s12] sm:$0xff] }
 0x3b2   : > { %1666 = vmatpush.bf16.msrb.mxu3 %v2648_v7  ;;  %v1809_v7 = vld [vmem:[%s3582_s15 + $0x10] sm:$0xff] }
 0x41e   : > { %v1369_v45 = vpop.f32.mrf.mxu1 }
 0x41f   : > { %v1378_v46 = vpack.c.bf16 %v1369_v45, %v1369_v45  ;;  %v2515_v45 = vld [vmem:[%s3581_s14 + $0x98] sm:$0xff] }
 0x421   : > { %2416 = vmatmul.msk.bf16.vlgmr.msra.gmra.mxu3 %vm1238_vm3, %v1378_v46  ;;  %v1736_v46 = vld [vmem:[%s3581_s14 + $0x10] sm:$0xff] }
 0x426   : > { %v1372_v47 = vpop.f32.mrf.mxu1 }
 0x427   : > { %v1387_v48 = vpack.c.bf16 %v1372_v47, %v1372_v47  ;;  %v2514_v47 = vld [vmem:[%s3581_s14 + $0x90] sm:$0xff] }
 0x429   : > { %2399 = vmatmul.msk.bf16.vlgmr.msrb.gmra.mxu0 %vm1238_vm3, %v1387_v48  ;;  %v1735_v48 = vld [vmem:[%s3581_s14 + $0x8] sm:$0xff] }
 0x42e   : > { %v1375_v49 = vpop.f32.mrf.mxu1 }
 0x42f   : > { %v1477_v50 = vpack.c.bf16 %v1375_v49, %v1375_v49  ;;  %v2513_v49 = vld [vmem:[%s3581_s14 + $0x88] sm:$0xff] }
 0x431   : > { %2441 = vmatmul.msk.bf16.vlgmr.msrb.gmra.mxu2 %vm1238_vm3, %v1477_v50  ;;  %v1734_v50 = vld [vmem:[%s3581_s14] sm:$0xff] }
 0x4a4   : > { %v1473_v51 = vpop.f32.mrf.mxu3 }
 0x4a6   : > { %v1433_v52 = vpop.f32.mrf.mxu0 }
 0x4a7   : > { %v1474_v58 = vadd.f32 %v1473_v51, %v1433_v52  ;;  %v2512_v51 = vld [vmem:[%s3581_s14 + $0x80] sm:$0xff] }
 0x4ac   : > { %v1475_v53 = vpop.f32.mrf.mxu3 }
 0x4ae   : > { %v1435_v54 = vpop.f32.mrf.mxu0 }
 0x4b4   : > { %v1523_v60 = vpop.f32.mrf.mxu2 }
 0x4b5   : > { %v1527_v62 = vadd.f32 %v1523_v60, %v1474_v58 }
 0x4b7   : > { %v1532_v63 = vadd.f32 %v2717_v59, %v1527_v62  ;;  %v2718_v59 = vld [vmem:[%s3580_s13] ss:$0 sm:$0xff] }
 0x4b9   : > { %v1533_v0 = vadd.f32 %v1532_v63, %v3211_v4  ;;  %v2654_v4 = vld [vmem:[%s3579_s12 + $0x30] sm:$0xff] }
 0x4ba   : > { %1624 = vmatpush.bf16.msrb.mxu1 %v2654_v4  ;;  %v1808_v4 = vld [vmem:[%s3582_s15 + $0x8] sm:$0xff] }
 0x4bb   : > { %v1534_v1 = vmax.f32 %v1533_v0, 0.0 }
 0x4bc   : > { %v1525_v3 = vpop.f32.mrf.mxu2 }
 0x4bd   : > { %1562 = vmatpush.msra.mxu0 %v1534_v1  ;;  %v2667_v3 = vld [vmem:[%s3583_s16 + $0x38] sm:$0xff] }
 0x4be   : > { %2442 = vmatmul.msk.f32.vlgmr.msra.gmra.mxu0 %vm1007_vm2, %v1535_v2  ;;  %1625 = vmatpush.bf16.msrb.mxu1 %v2653_v8  ;;  %v2666_v8 = vld [vmem:[%s3583_s16 + $0x30] sm:$0xff] }
 0x4bf   : > { %1750 = vmatpush.msrb.mxu0 %v1749_v14  ;;  %1895 = vmatpush.bf16.msrb.mxu2 %v2667_v3  ;;  %v2669_v14 = vld [vmem:[%s3583_s16 + $0x48] sm:$0xff] }
 0x4c1   : > { %1751 = vmatpush.msrb.mxu0 %v1748_v16  ;;  %v2661_v16 = vld [vmem:[%s3583_s16 + $0x8] sm:$0xff] }
 0x4c2   : > { %1626 = vmatpush.bf16.msrb.mxu1 %v2652_v10  ;;  %v2671_v10 = vld [vmem:[%s3583_s16 + $0x58] sm:$0xff] }
 0x4c3   : > { %1752 = vmatpush.msrb.mxu0 %v1747_v18  ;;  %1896 = vmatpush.bf16.msrb.mxu2 %v2666_v8  ;;  %v2660_v18 = vld [vmem:[%s3583_s16] sm:$0xff] }
 0x4c5   : > { %1753 = vmatpush.msrb.mxu0 %v1746_v20 }
 0x4c6   : > { %2443 = vmatmul.msk.f32.gmra.mxu0 %vm1007_vm2, %v1536_v5  ;;  %1787 = vmatpush.msra.mxu1 %v2527_v15  ;;  %v1807_v5 = vld [vmem:[%s3582_s15] sm:$0xff]  ;;  %v2662_v15 = vld [vmem:[%s3583_s16 + $0x10] sm:$0xff] }
 0x4c7   : > { %1754 = vmatpush.msrb.mxu0 %v1745_v28  ;;  %1897 = vmatpush.bf16.msrb.mxu2 %v2665_v9 }
 0x4c8   : > { %1788 = vmatpush.msra.mxu1 %v2526_v17  ;;  %v2668_v17 = vld [vmem:[%s3583_s16 + $0x40] sm:$0xff] }
 0x4c9   : > { %1755 = vmatpush.msrb.mxu0 %v1744_v30  ;;  %v2029_v30 = vld [vmem:[%s3586_s19 + $0x18] sm:$0xff] }
 0x4ca   : > { %1789 = vmatpush.msra.mxu1 %v2525_v19 }
 0x4cb   : > { %1756 = vmatpush.msrb.mxu0 %v1743_v32  ;;  %1898 = vmatpush.bf16.msrb.mxu2 %v2664_v11  ;;  %v2027_v32 = vld [vmem:[%s3586_s19 + $0x8] sm:$0xff] }
 0x4cc   : > { %1790 = vmatpush.msra.mxu1 %v2524_v21 }
 0x4cd   : > { %1757 = vmatpush.msrb.mxu0 %v1742_v34 }
 0x4ce   : > { %2444 = vmatmul.msk.f32.gmra.mxu0 %vm1007_vm2, %v1537_v6  ;;  %1791 = vmatpush.msra.mxu1 %v2523_v29  ;;  %v2030_v29 = vld [vmem:[%s3586_s19 + $0x20] sm:$0xff] }
 0x4cf   : > { %1758 = vmatpush.msrb.mxu0 %v1741_v36 }
 0x4d0   : > { %1792 = vmatpush.msra.mxu1 %v2522_v31  ;;  %v2028_v31 = vld [vmem:[%s3586_s19 + $0x10] sm:$0xff] }
 0x4d1   : > { %1759 = vmatpush.msrb.mxu0 %v1740_v38  ;;  %v2719_v38 = vld [vmem:[%s3584_s17] ss:$0 sm:$0xff] }
 0x4d2   : > { %1793 = vmatpush.msra.mxu1 %v2521_v33 }
 0x4d3   : > { %1760 = vmatpush.msrb.mxu0 %v1739_v40 }
 0x4d4   : > { %1794 = vmatpush.msra.mxu1 %v2520_v35 }
 0x4d5   : > { %1761 = vmatpush.msrb.mxu0 %v1738_v42 }
 0x4d6   : > { %1795 = vmatpush.msra.mxu1 %v2519_v37 }
 0x4d7   : > { %1762 = vmatpush.msrb.mxu0 %v1737_v44 }
 0x4d8   : > { %1796 = vmatpush.msra.mxu1 %v2518_v39 }
 0x4d9   : > { %1763 = vmatpush.msrb.mxu0 %v1736_v46  ;;  %v2026_v46 = vld [vmem:[%s3586_s19] sm:$0xff] }
 0x4da   : > { %1797 = vmatpush.msra.mxu1 %v2517_v41 }
 0x4db   : > { %1764 = vmatpush.msrb.mxu0 %v1735_v48 }
 0x4dc   : > { %1798 = vmatpush.msra.mxu1 %v2516_v43 }
 0x4dd   : > { %1765 = vmatpush.msrb.mxu0 %v1734_v50 }
 0x4de   : > { %1799 = vmatpush.msra.mxu1 %v2515_v45  ;;  %v2002_v45 = vld [vmem:[%s3585_s18] sm:$0x1] }
 0x4e0   : > { %1800 = vmatpush.msra.mxu1 %v2514_v47 }
 0x4e2   : > { %1801 = vmatpush.msra.mxu1 %v2513_v49 }
 0x4e4   : > { %1802 = vmatpush.msra.mxu1 %v2512_v51 }
 0x53b   : > { %v1564_v22 = vpop.f32.mrf.mxu0 }
 0x53c   : > { %v1573_v23 = vpack.c.bf16 %v1564_v22, %v1564_v22 }
 0x53e   : > { %2486 = vmatmul.msk.bf16.vlgmr.msrb.gmra.mxu3 %vm1238_vm3, %v1573_v23 }
 0x543   : > { %v1567_v24 = vpop.f32.mrf.mxu0 }
 0x544   : > { %v1582_v25 = vpack.c.bf16 %v1567_v24, %v1567_v24 }
 0x546   : > { %2469 = vmatmul.msk.bf16.vlgmr.msrb.gmra.mxu1 %vm1238_vm3, %v1582_v25  ;;  %v2033_v25 = vld [vmem:[%s3586_s19 + $0x38] sm:$0xff] }
 0x547   : > { %2045 = vmatpush.msrb.mxu1 %v2033_v25 }
 0x54b   : > { %v1570_v26 = vpop.f32.mrf.mxu0 }
 0x54c   : > { %v1672_v27 = vpack.c.bf16 %v1570_v26, %v1570_v26  ;;  %v2032_v26 = vld [vmem:[%s3586_s19 + $0x30] sm:$0xff] }
 0x54d   : > { %2046 = vmatpush.msrb.mxu1 %v2032_v26 }
 0x54e   : > { %2511 = vmatmul.msk.bf16.vlgmr.msra.gmra.mxu2 %vm1238_vm3, %v1672_v27  ;;  %v2031_v27 = vld [vmem:[%s3586_s19 + $0x28] sm:$0xff] }
 0x54f   : > { %1935 = vmatpush.bf16.msra.mxu2 %v2663_v13  ;;  %2047 = vmatpush.msrb.mxu1 %v2031_v27 }
 0x551   : > { %2048 = vmatpush.msrb.mxu1 %v2030_v29 }
 0x553   : > { %1936 = vmatpush.bf16.msra.mxu2 %v2662_v15  ;;  %2049 = vmatpush.msrb.mxu1 %v2029_v30 }
 0x555   : > { %2050 = vmatpush.msrb.mxu1 %v2028_v31 }
 0x557   : > { %1937 = vmatpush.bf16.msra.mxu2 %v2661_v16  ;;  %2051 = vmatpush.msrb.mxu1 %v2027_v32 }
 0x559   : > { %2052 = vmatpush.msrb.mxu1 %v2026_v46 }
 0x55b   : > { %1938 = vmatpush.bf16.msra.mxu2 %v2660_v18 }
 0x5c1   : > { %v1668_v52 = vpop.f32.mrf.mxu3 }
 0x5c3   : > { %v1628_v53 = vpop.f32.mrf.mxu1 }
 0x5c4   : > { %v1669_v58 = vadd.f32 %v1668_v52, %v1628_v53 }
 0x5c9   : > { %v1670_v54 = vpop.f32.mrf.mxu3 }
 0x5cb   : > { %v1630_v56 = vpop.f32.mrf.mxu1 }
 0x5d1   : > { %v1718_v60 = vpop.f32.mrf.mxu2 }
 0x5d2   : > { %v1722_v62 = vadd.f32 %v1718_v60, %v1669_v58 }
 0x5d4   : > { %v1727_v63 = vadd.f32 %v2718_v59, %v1722_v62 }
 0x5d6   : > { %v1732_v0 = vmax.f32 %v1727_v63, 0.0 }
 0x5d8   : > { %v1733_v1 = vsel %vm1731_vm4, %v1732_v0, %v1727_v63 }
 0x5d9   : > { %v1720_v2 = vpop.f32.mrf.mxu2  ;;  %1766 = vmatmul.f32.vlgmr.msrb.gmra.mxu0 %v1733_v1  ;;  %1803 = vmatmul.f32.vlgmr.msra.gmra.mxu1 %v1733_v1 }
 0x656   : > { %v1767_v6 = vpop.f32.mrf.mxu0  ;;  %v1804_v41 = vpop.f32.mrf.mxu1 }
 0x657   : > { %1834 = vmatpush.msra.mxu3 %v1767_v6 }
 0x658   : > { %2528 = vmatmul.msk.f32.vlgmr.msra.gmra.mxu3 %vm1007_vm2, %v1807_v5 }
 0x659   : > { %1985 = vmatpush.bf16.msrb.mxu3 %v2671_v10 }
 0x65d   : > { %1986 = vmatpush.bf16.msrb.mxu3 %v2670_v12 }
 0x660   : > { %2529 = vmatmul.msk.f32.gmra.mxu3 %vm1007_vm2, %v1808_v4 }
 0x661   : > { %1987 = vmatpush.bf16.msrb.mxu3 %v2669_v14 }
 0x665   : > { %1988 = vmatpush.bf16.msrb.mxu3 %v2668_v17 }
 0x668   : > { %2530 = vmatmul.msk.f32.gmra.mxu3 %vm1007_vm2, %v1809_v7 }
 0x6db   : > { %v1836_v19 = vpop.f32.mrf.mxu3 }
 0x6dc   : > { %v1845_v24 = vpack.c.bf16 %v1836_v19, %v1836_v19 }
 0x6e3   : > { %v1839_v20 = vpop.f32.mrf.mxu3 }
 0x6e4   : > { %v1854_v21 = vpack.c.bf16 %v1839_v20, %v1839_v20 }
 0x6e6   : > { %2555 = vmatmul.msk.bf16.vlgmr.msrb.gmra.mxu2 %vm1238_vm3, %v1854_v21 }
 0x6eb   : > { %v1842_v22 = vpop.f32.mrf.mxu3 }
 0x6ec   : > { %v1944_v23 = vpack.c.bf16 %v1842_v22, %v1842_v22 }
 0x6ee   : > { %2597 = vmatmul.msk.bf16.vlgmr.msrb.gmra.mxu3 %vm1238_vm3, %v1944_v23 }
 0x6f6   : > { %2572 = vmatmul.msk.bf16.vlgmr.msra.gmra.mxu2 %vm1238_vm3, %v1845_v24 }
 0x769   : > { %v1900_v28 = vpop.f32.mrf.mxu2 }
 0x771   : > { %v1902_v33 = vpop.f32.mrf.mxu2  ;;  %v1990_v34 = vpop.f32.mrf.mxu3 }
 0x779   : > { %v1940_v35 = vpop.f32.mrf.mxu2  ;;  %v1992_v36 = vpop.f32.mrf.mxu3 }
 0x77a   : > { %v1941_v37 = vadd.f32 %v1940_v35, %v1900_v28 }
 0x77c   : > { %v1994_v39 = vadd.f32 %v1990_v34, %v1941_v37 }
 0x77e   : > { %v1999_v40 = vadd.f32 %v2719_v38, %v1994_v39 }
 0x780   : > { %v2000_v42 = vadd.f32 %v1999_v40, %v1804_v41 }
 0x781   : > { %v1942_v43 = vpop.f32.mrf.mxu2 }
 0x782   : > { %v2001_v44 = vmax.f32 %v2000_v42, 0.0 }
 0x784   : > { %2021 = vmatpush.msra.mxu0 %v2001_v44 }
 0x785   : > { %2598 = vmatmul.msk.f32.vlgmr.msra.gmra.mxu0 %vm1007_vm2, %v2002_v45 }
 0x802   : > { %v2023_v47 = vpop.f32.mrf.mxu0 }
 0x803   : > { %2599 = vmatmul.msk.f32.vlgmr.msrb.gmra.mxu1 %vm1238_vm3, %v2023_v47 }
 0x880   : > { %v2054_v48 = vpop.f32.mrf.mxu1 }
 0x881   : > { %2058 = vst.msk [vmem:[%s621_s1] sm:$0x1] %vm2057_vm5, %v2054_v48 }
 0x882   : > { %2747 = shalt.err (!%p2744_p3)
}
 0x883   : > { %2676 = dma.vmem_to_hbm [thread:$0]  (%p2927_p5), %s2071_s29, 16, %s2073_s30, %s2060_s0  }
 0x884 PF: > { %s3624_s3 = sld [smem:[#allocation7_spill]] }
 0x885   : > { %s3625_s27 = sld [smem:[#allocation5_spill]] }
 0x88a   : > { %p2682_p4 = scmp.ge.s32.totalorder %s3624_s3, 2 }
 0x88b   : > { %s2084_s7 = sand.u32 1, %s3625_s27  }
 0x88c   : > { %p2679_p7 = pnand %p2682_p4, %p2931_p6  ;;  %s2085_s5 = scalar_lea.sflag [#allocation3], %s2084_s7 }
 0x88e   : > { %p2680_p8 = pneg %p2679_p7 }
 0x890   : > { %2765 = dma.done.wait (%p2680_p8), %s2085_s5, 16  }
 0x891   : > { %2767 = vsyncadd (%p2680_p8), %s2085_s5, 4294967280  ;;  %s3627_s24 = sld [smem:[#allocation8_spill]]  ;;  %s3630_s1 = smov %s2774_s22 }
 0x892   : > { %s3628_s6 = sld [smem:[#allocation6_spill]] }
 0x893   : > { %s3629_s23 = sld [smem:[#allocation9_spill]] }
 0x897   : > { %p30_p9 = scmp.ge.s32.totalorder %s3627_s24, 4  }
 0x898   : > { %s3631_s22 = smov %s3628_s6 }
 0x899   :  { %32 = sbr.rel (!%p30_p9) target bundleno = 12 (0xc), region = 152 }
 0x89e   :  { %2090 = vsyncpa [#allocation3], 1 }
 0x89f   :  { %2092 = vsyncpa [#allocation3 + $0x1], 1 }

</bundles_post_ra>
